<compile_context>
chip_gen: v5e
topology: v5e:2x2
jax: 0.10.0
libtpu: 0.0.40
codegen_flags: <defaults>
</compile_context>

<pallas_src>
import functools

import numpy as np
import jax
import jax.numpy as jnp
from jax.experimental import pallas as pl
from jax.experimental.pallas import tpu as pltpu

EPS = 1e-5


# ------------------------------ fused kernel --------------------------------

def _bn_affine(y, gamma_t, beta_t, n_ch, relu):
    """Train-mode BatchNorm (+ optional ReLU) on a (R, W*C) image-layout slab.

    Channel c lives in columns {w*C + c}.  One-pass stats: per-(w,c) column
    sums / sums-of-squares, then a (W*C, W*C) channel-projector matmul folds
    the W groups together and broadcasts the per-channel mean / E[y^2] back to
    the tiled layout (avoids in-kernel reshapes; biased variance like
    nn.BatchNorm2d in training mode).
    """
    rows, wc = y.shape
    cnt = rows * (wc // n_ch)                      # = N*H*W elements per channel
    ii = jax.lax.broadcasted_iota(jnp.int32, (wc, wc), 0) % n_ch
    jj = jax.lax.broadcasted_iota(jnp.int32, (wc, wc), 1) % n_ch
    proj = jnp.where(ii == jj, jnp.float32(1.0 / cnt), jnp.float32(0.0))
    col_sum = jnp.sum(y, axis=0, keepdims=True)            # (1, W*C)
    col_sq = jnp.sum(y * y, axis=0, keepdims=True)         # (1, W*C)
    mean_t = jnp.dot(col_sum, proj, preferred_element_type=jnp.float32)
    ex2_t = jnp.dot(col_sq, proj, preferred_element_type=jnp.float32)
    var_t = ex2_t - mean_t * mean_t                        # biased (train mode)
    out = (y - mean_t) * jax.lax.rsqrt(var_t + EPS) * gamma_t + beta_t
    if relu:
        out = jnp.maximum(out, 0.0)
    return out


def _fused_block_kernel(*refs, H, W, mid, cout, has_shortcut):
    # refs = (x, w1k, w2band, w3k, [wsk], aff, out, pad_scratch)
    if has_shortcut:
        x_ref, w1_ref, w2_ref, w3_ref, ws_ref, aff_ref, o_ref, pad_ref = refs
    else:
        x_ref, w1_ref, w2_ref, w3_ref, aff_ref, o_ref, pad_ref = refs
        ws_ref = None

    nh = x_ref.shape[0]          # N*H rows
    wm = W * mid                 # lane width of mid-channel slabs
    wo = W * cout                # lane width of out-channel slabs (multiple of 128 here)

    x = x_ref[...]                                   # (NH, W*Cin) f32
    xb = x.astype(jnp.bfloat16)

    # residual path (block 0: fused 1x1 shortcut conv; else identity)
    if has_shortcut:
        res = jnp.dot(xb, ws_ref[...], preferred_element_type=jnp.float32)
        res = res + aff_ref[9:10, :wo]
    else:
        res = x                                      # Cin == Cout for blocks >= 1

    # ---- stage 1: 1x1 conv + BN + ReLU -------------------------------------
    y1 = jnp.dot(xb, w1_ref[...], preferred_element_type=jnp.float32)
    y1 = y1 + aff_ref[0:1, :wm]
    h1 = _bn_affine(y1, aff_ref[1:2, :wm], aff_ref[2:3, :wm], mid, relu=True)

    # ---- stage 2: 3x3 conv as 3 shifted banded accumulated dots ------------
    # zero-padded VMEM scratch gives the +/-1 vertical shifts; rows that would
    # cross a batch boundary are masked with an iota-derived row index.
    pad_ref[0:1, :] = jnp.zeros((1, wm), jnp.float32)
    pad_ref[nh + 1:nh + 2, :] = jnp.zeros((1, wm), jnp.float32)
    pad_ref[1:nh + 1, :] = h1
    row_h = jax.lax.broadcasted_iota(jnp.int32, (nh, wm), 0) % H
    acc = None
    for dh in (-1, 0, 1):
        shifted = pad_ref[1 + dh:1 + dh + nh, :]     # (NH, W*mid), rows r+dh
        if dh == -1:
            shifted = jnp.where(row_h == 0, 0.0, shifted)
        elif dh == 1:
            shifted = jnp.where(row_h == H - 1, 0.0, shifted)
        part = jnp.dot(shifted.astype(jnp.bfloat16), w2_ref[dh + 1],
                       preferred_element_type=jnp.float32)
        acc = part if acc is None else acc + part
    y2 = acc + aff_ref[3:4, :wm]
    h2 = _bn_affine(y2, aff_ref[4:5, :wm], aff_ref[5:6, :wm], mid, relu=True)

    # ---- stage 3: 1x1 conv + BN, residual add, final ReLU (single store) ---
    y3 = jnp.dot(h2.astype(jnp.bfloat16), w3_ref[...],
                 preferred_element_type=jnp.float32)
    y3 = y3 + aff_ref[6:7, :wo]
    h3 = _bn_affine(y3, aff_ref[7:8, :wo], aff_ref[8:9, :wo], cout, relu=False)
    o_ref[...] = jnp.maximum(h3 + res, 0.0)


# ------------------------------ call wrapper ---------------------------------

def _zero_index_map(ndim):
    return lambda i: (0,) * ndim


def _fused_block_call(x_img, blk, *, H, W):
    nh, wi = x_img.shape
    mid, cout = blk["mid"], blk["cout"]
    wm, wo = W * mid, W * cout
    has_sc = blk["wsk"] is not None

    operands = [x_img, blk["w1k"], blk["w2band"], blk["w3k"]]
    if has_sc:
        operands.append(blk["wsk"])
    operands.append(blk["aff"])

    kernel = functools.partial(_fused_block_kernel, H=H, W=W, mid=mid,
                               cout=cout, has_shortcut=has_sc)

    flops = 2 * nh * (wi * wm + 3 * wm * wm + wm * wo + (wi * wo if has_sc else 0))
    bytes_accessed = int(sum(int(a.size) * a.dtype.itemsize for a in operands)
                         + nh * wo * 4)

    return pl.pallas_call(
        kernel,
        out_shape=jax.ShapeDtypeStruct((nh, wo), jnp.float32),
        grid=(1,),
        in_specs=[pl.BlockSpec(a.shape, _zero_index_map(a.ndim)) for a in operands],
        out_specs=pl.BlockSpec((nh, wo), _zero_index_map(2)),
        scratch_shapes=[pltpu.VMEM((nh + 2, wm), jnp.float32)],
        compiler_params=pltpu.CompilerParams(dimension_semantics=("arbitrary",)),
        cost_estimate=pl.CostEstimate(flops=flops, transcendentals=3 * wo,
                                      bytes_accessed=bytes_accessed),
    )(*operands)


# ------------------------------- parameters ----------------------------------

def init_params(key, input_ch, mid_ch, out_ch, num_blocks, img_downsize):
    """Raw (PyTorch-layout) parameters for the module."""
    params = {"blocks": []}
    key, k1, k2 = jax.random.split(key, 3)
    params["shortcut_stride"] = 1 if input_ch == mid_ch else 2
    params["ws"] = jax.random.normal(k1, (input_ch, out_ch), jnp.float32) / np.sqrt(input_ch)
    params["bs"] = 0.1 * jax.random.normal(k2, (out_ch,), jnp.float32)

    cur_in, cur_down = input_ch, img_downsize
    for _ in range(num_blocks):
        keys = jax.random.split(key, 14)
        key = keys[0]
        bp = {
            "stride1": 2 if cur_down else 1,
            "w1": jax.random.normal(keys[1], (cur_in, mid_ch), jnp.float32) / np.sqrt(cur_in),
            "b1": 0.1 * jax.random.normal(keys[2], (mid_ch,), jnp.float32),
            "g1": 1.0 + 0.1 * jax.random.normal(keys[3], (mid_ch,), jnp.float32),
            "be1": 0.1 * jax.random.normal(keys[4], (mid_ch,), jnp.float32),
            # conv2 weight in PyTorch layout (Cout, Cin, 3, 3)
            "w2": jax.random.normal(keys[5], (mid_ch, mid_ch, 3, 3), jnp.float32)
                  / np.sqrt(mid_ch * 9),
            "b2": 0.1 * jax.random.normal(keys[6], (mid_ch,), jnp.float32),
            "g2": 1.0 + 0.1 * jax.random.normal(keys[7], (mid_ch,), jnp.float32),
            "be2": 0.1 * jax.random.normal(keys[8], (mid_ch,), jnp.float32),
            "w3": jax.random.normal(keys[9], (mid_ch, out_ch), jnp.float32) / np.sqrt(mid_ch),
            "b3": 0.1 * jax.random.normal(keys[10], (out_ch,), jnp.float32),
            "g3": 1.0 + 0.1 * jax.random.normal(keys[11], (out_ch,), jnp.float32),
            "be3": 0.1 * jax.random.normal(keys[12], (out_ch,), jnp.float32),
        }
        params["blocks"].append(bp)
        cur_down = False                 # mirrors the PyTorch __init__ loop
        cur_in = out_ch
    return params


def _kron_eye(w, W):
    """1x1-conv weight (Cin, Cout) -> block-diagonal (W*Cin, W*Cout)."""
    return np.kron(np.eye(W, dtype=np.float32), np.asarray(w, np.float32))


def _band3x3(w2, W):
    """3x3-conv weight (Cout, Cin, 3, 3) -> 3 banded (W*Cin, W*Cout) matrices,
    one per vertical offset dh; horizontal offsets dw live inside the band."""
    w2 = np.asarray(w2, np.float32)
    cout, cin = w2.shape[0], w2.shape[1]
    bands = np.zeros((3, W * cin, W * cout), np.float32)
    for dh in (-1, 0, 1):
        for w_out in range(W):
            for dw in (-1, 0, 1):
                w_in = w_out + dw
                if 0 <= w_in < W:
                    bands[dh + 1,
                          w_in * cin:(w_in + 1) * cin,
                          w_out * cout:(w_out + 1) * cout] = w2[:, :, dh + 1, dw + 1].T
    return bands


def _tile_row(v, W, width):
    t = np.tile(np.asarray(v, np.float32).reshape(-1), W)
    row = np.zeros((width,), np.float32)
    row[:t.shape[0]] = t
    return row


def pack_params(raw, W, input_ch, out_ch):
    """Host-side layout plumbing (done once): expand raw weights into the
    lane-dense image-layout operands consumed by the fused kernels."""
    mismatch = input_ch != out_ch
    blocks = []
    for i, bp in enumerate(raw["blocks"]):
        mid = bp["w1"].shape[1]
        width = max(W * mid, W * out_ch)
        use_sc = mismatch and i == 0
        aff = np.stack([
            _tile_row(bp["b1"], W, width), _tile_row(bp["g1"], W, width),
            _tile_row(bp["be1"], W, width),
            _tile_row(bp["b2"], W, width), _tile_row(bp["g2"], W, width),
            _tile_row(bp["be2"], W, width),
            _tile_row(bp["b3"], W, width), _tile_row(bp["g3"], W, width),
            _tile_row(bp["be3"], W, width),
            _tile_row(raw["bs"], W, width) if use_sc else np.zeros((width,), np.float32),
        ])
        blocks.append({
            "mid": mid, "cout": out_ch,
            "w1k": jnp.asarray(_kron_eye(bp["w1"], W), jnp.bfloat16),
            "w2band": jnp.asarray(_band3x3(bp["w2"], W), jnp.bfloat16),
            "w3k": jnp.asarray(_kron_eye(bp["w3"], W), jnp.bfloat16),
            "wsk": jnp.asarray(_kron_eye(raw["ws"], W), jnp.bfloat16) if use_sc else None,
            "aff": jnp.asarray(aff, jnp.float32),
        })
    return blocks


# --------------------------------- forward -----------------------------------

def bottleneck_forward(x_nchw, packed_blocks, out_ch):
    n, c, h, w = x_nchw.shape
    # NCHW -> lane-dense image layout (N*H, W*C), channel fastest.
    x_img = jnp.transpose(x_nchw, (0, 2, 3, 1)).reshape(n * h, w * c)
    # TODO(synk): stride-2 variants (img_downsize=True / input_ch != in_ch) would
    # need a host-side spatial downsample before the fused block kernel; the
    # configuration used here has stride 1 everywhere, matching the module.
    for blk in packed_blocks:
        x_img = _fused_block_call(x_img, blk, H=h, W=w)
    out = x_img.reshape(n, h, w, out_ch)
    return jnp.transpose(out, (0, 3, 1, 2))           # NHWC -> NCHW


# ----------------------------------- main -------------------------------------

if __name__ == "__main__":
    INPUT_CH, MID_CH, OUT_CH = 4, 4, 8
    NUM_BLOCKS, IMG_DOWNSIZE = 2, False
    N, H, W = 2, 16, 16

    key = jax.random.PRNGKey(0)
    kx, kp = jax.random.split(key)
    x = jax.random.normal(kx, (N, INPUT_CH, H, W), jnp.float32)   # NCHW like PyTorch

    raw = init_params(kp, INPUT_CH, MID_CH, OUT_CH, NUM_BLOCKS, IMG_DOWNSIZE)
    packed = pack_params(raw, W, INPUT_CH, OUT_CH)

    out = bottleneck_forward(x, packed, OUT_CH)
    out = jax.block_until_ready(out)
    assert out.shape == (N, OUT_CH, H, W), out.shape
    # TODO(synk): BatchNorm running_mean/var buffer updates (module state) are
    # not reproduced; normalization itself uses train-mode batch statistics.
    print("KERNEL_OK")
</pallas_src>

<mosaic_0001>
module attributes {stable_mosaic.version = 11 : i64} {
  func.func @_fused_block_kernel(%arg0: i32, %arg1: memref<32x64xf32, #tpu.memory_space<vmem>>, %arg2: memref<64x64xbf16, #tpu.memory_space<vmem>>, %arg3: memref<3x64x64xbf16, #tpu.memory_space<vmem>>, %arg4: memref<64x128xbf16, #tpu.memory_space<vmem>>, %arg5: memref<64x128xbf16, #tpu.memory_space<vmem>>, %arg6: memref<10x128xf32, #tpu.memory_space<vmem>>, %arg7: memref<32x128xf32, #tpu.memory_space<vmem>>, %arg8: memref<34x64xf32, #tpu.memory_space<vmem>>) attributes {dimension_semantics = [#tpu.dimension_semantics<arbitrary>], iteration_bounds = array<i64: 1>, scalar_prefetch = 0 : i64, scratch_operands = 1 : i64, tpu.core_type = #tpu.core_type<tc>, window_params = [{pipeline_mode = #tpu.pipeline_mode<synchronous>, transform_indices = @transform_0, window_bounds = array<i64: 32, 64>}, {pipeline_mode = #tpu.pipeline_mode<synchronous>, transform_indices = @transform_1, window_bounds = array<i64: 64, 64>}, {pipeline_mode = #tpu.pipeline_mode<synchronous>, transform_indices = @transform_2, window_bounds = array<i64: 3, 64, 64>}, {pipeline_mode = #tpu.pipeline_mode<synchronous>, transform_indices = @transform_3, window_bounds = array<i64: 64, 128>}, {pipeline_mode = #tpu.pipeline_mode<synchronous>, transform_indices = @transform_4, window_bounds = array<i64: 64, 128>}, {pipeline_mode = #tpu.pipeline_mode<synchronous>, transform_indices = @transform_5, window_bounds = array<i64: 10, 128>}, {pipeline_mode = #tpu.pipeline_mode<synchronous>, transform_indices = @transform_6, window_bounds = array<i64: 32, 128>}]} {
    %c0 = arith.constant 0 : index
    %c0_0 = arith.constant 0 : index
    %0 = vector.load %arg1[%c0, %c0_0] : memref<32x64xf32, #tpu.memory_space<vmem>>, vector<32x64xf32>
    %1 = arith.truncf %0 : vector<32x64xf32> to vector<32x64xbf16>
    %c0_1 = arith.constant 0 : index
    %c0_2 = arith.constant 0 : index
    %2 = vector.load %arg5[%c0_1, %c0_2] : memref<64x128xbf16, #tpu.memory_space<vmem>>, vector<64x128xbf16>
    %cst = arith.constant dense<0.000000e+00> : vector<32x128xf32>
    %3 = tpu.matmul %1, %2, %cst {dimension_numbers = #tpu.dot_dimension_numbers<[1], [0], [0], [1], [0, 0, 1, 1], [], []>} : vector<32x64xbf16>, vector<64x128xbf16>, vector<32x128xf32> -> vector<32x128xf32>
    %c9 = arith.constant 9 : index
    %c0_3 = arith.constant 0 : index
    %4 = vector.load %arg6[%c9, %c0_3] : memref<10x128xf32, #tpu.memory_space<vmem>>, vector<1x128xf32>
    %5 = vector.broadcast %4 : vector<1x128xf32> to vector<32x128xf32>
    %6 = arith.addf %3, %5 : vector<32x128xf32>
    %c0_4 = arith.constant 0 : index
    %c0_5 = arith.constant 0 : index
    %7 = vector.load %arg2[%c0_4, %c0_5] : memref<64x64xbf16, #tpu.memory_space<vmem>>, vector<64x64xbf16>
    %cst_6 = arith.constant dense<0.000000e+00> : vector<32x64xf32>
    %8 = tpu.matmul %1, %7, %cst_6 {dimension_numbers = #tpu.dot_dimension_numbers<[1], [0], [0], [1], [0, 0, 1, 1], [], []>} : vector<32x64xbf16>, vector<64x64xbf16>, vector<32x64xf32> -> vector<32x64xf32>
    %c0_7 = arith.constant 0 : index
    %c0_8 = arith.constant 0 : index
    %9 = vector.load %arg6[%c0_7, %c0_8] : memref<10x128xf32, #tpu.memory_space<vmem>>, vector<1x64xf32>
    %10 = vector.broadcast %9 : vector<1x64xf32> to vector<32x64xf32>
    %11 = arith.addf %8, %10 : vector<32x64xf32>
    %c1 = arith.constant 1 : index
    %c0_9 = arith.constant 0 : index
    %12 = vector.load %arg6[%c1, %c0_9] : memref<10x128xf32, #tpu.memory_space<vmem>>, vector<1x64xf32>
    %c2 = arith.constant 2 : index
    %c0_10 = arith.constant 0 : index
    %13 = vector.load %arg6[%c2, %c0_10] : memref<10x128xf32, #tpu.memory_space<vmem>>, vector<1x64xf32>
    %14 = tpu.iota {dimensions = array<i32: 0>} : vector<64x64xi32>
    %c4_i32 = arith.constant 4 : i32
    %c0_i32 = arith.constant 0 : i32
    %15 = arith.cmpi eq, %c4_i32, %c0_i32 : i32
    %c1_i32 = arith.constant 1 : i32
    %16 = arith.select %15, %c1_i32, %c4_i32 : i32
    %17 = vector.broadcast %16 : i32 to vector<64x64xi32>
    %18 = arith.remsi %14, %17 : vector<64x64xi32>
    %c0_i32_11 = arith.constant 0 : i32
    %19 = vector.broadcast %c0_i32_11 : i32 to vector<64x64xi32>
    %20 = arith.cmpi ne, %18, %19 : vector<64x64xi32>
    %c0_i32_12 = arith.constant 0 : i32
    %21 = vector.broadcast %c0_i32_12 : i32 to vector<64x64xi32>
    %22 = arith.cmpi slt, %18, %21 : vector<64x64xi32>
    %c0_i32_13 = arith.constant 0 : i32
    %23 = arith.cmpi slt, %16, %c0_i32_13 : i32
    %24 = vector.broadcast %23 : i1 to vector<64x64xi1>
    %25 = vector.broadcast %24 : vector<64x64xi1> to vector<64x64xi1>
    %26 = arith.xori %22, %25 : vector<64x64xi1>
    %27 = arith.andi %26, %20 : vector<64x64xi1>
    %28 = vector.broadcast %16 : i32 to vector<64x64xi32>
    %29 = arith.addi %18, %28 : vector<64x64xi32>
    %30 = arith.select %27, %29, %18 : vector<64x64xi1>, vector<64x64xi32>
    %31 = tpu.iota {dimensions = array<i32: 1>} : vector<64x64xi32>
    %c4_i32_14 = arith.constant 4 : i32
    %c0_i32_15 = arith.constant 0 : i32
    %32 = arith.cmpi eq, %c4_i32_14, %c0_i32_15 : i32
    %c1_i32_16 = arith.constant 1 : i32
    %33 = arith.select %32, %c1_i32_16, %c4_i32_14 : i32
    %34 = vector.broadcast %33 : i32 to vector<64x64xi32>
    %35 = arith.remsi %31, %34 : vector<64x64xi32>
    %c0_i32_17 = arith.constant 0 : i32
    %36 = vector.broadcast %c0_i32_17 : i32 to vector<64x64xi32>
    %37 = arith.cmpi ne, %35, %36 : vector<64x64xi32>
    %c0_i32_18 = arith.constant 0 : i32
    %38 = vector.broadcast %c0_i32_18 : i32 to vector<64x64xi32>
    %39 = arith.cmpi slt, %35, %38 : vector<64x64xi32>
    %c0_i32_19 = arith.constant 0 : i32
    %40 = arith.cmpi slt, %33, %c0_i32_19 : i32
    %41 = vector.broadcast %40 : i1 to vector<64x64xi1>
    %42 = vector.broadcast %41 : vector<64x64xi1> to vector<64x64xi1>
    %43 = arith.xori %39, %42 : vector<64x64xi1>
    %44 = arith.andi %43, %37 : vector<64x64xi1>
    %45 = vector.broadcast %33 : i32 to vector<64x64xi32>
    %46 = arith.addi %35, %45 : vector<64x64xi32>
    %47 = arith.select %44, %46, %35 : vector<64x64xi1>, vector<64x64xi32>
    %48 = arith.cmpi eq, %30, %47 : vector<64x64xi32>
    %cst_20 = arith.constant 0.001953125 : f32
    %cst_21 = arith.constant 0.000000e+00 : f32
    %49 = vector.broadcast %cst_20 : f32 to vector<64x64xf32>
    %50 = vector.broadcast %cst_21 : f32 to vector<64x64xf32>
    %51 = arith.select %48, %49, %50 : vector<64x64xi1>, vector<64x64xf32>
    %cst_22 = arith.constant dense<0.000000e+00> : vector<64xf32>
    %52 = vector.multi_reduction <add>, %11, %cst_22 [0] : vector<32x64xf32> to vector<64xf32>
    %53 = vector.shape_cast %52 : vector<64xf32> to vector<1x64xf32>
    %54 = arith.mulf %11, %11 : vector<32x64xf32>
    %cst_23 = arith.constant dense<0.000000e+00> : vector<64xf32>
    %55 = vector.multi_reduction <add>, %54, %cst_23 [0] : vector<32x64xf32> to vector<64xf32>
    %56 = vector.shape_cast %55 : vector<64xf32> to vector<1x64xf32>
    %cst_24 = arith.constant dense<0.000000e+00> : vector<1x64xf32>
    %57 = tpu.matmul %53, %51, %cst_24 {dimension_numbers = #tpu.dot_dimension_numbers<[1], [0], [0], [1], [0, 0, 1, 1], [], []>} : vector<1x64xf32>, vector<64x64xf32>, vector<1x64xf32> -> vector<1x64xf32>
    %cst_25 = arith.constant dense<0.000000e+00> : vector<1x64xf32>
    %58 = tpu.matmul %56, %51, %cst_25 {dimension_numbers = #tpu.dot_dimension_numbers<[1], [0], [0], [1], [0, 0, 1, 1], [], []>} : vector<1x64xf32>, vector<64x64xf32>, vector<1x64xf32> -> vector<1x64xf32>
    %59 = arith.mulf %57, %57 : vector<1x64xf32>
    %60 = arith.subf %58, %59 : vector<1x64xf32>
    %61 = vector.broadcast %57 : vector<1x64xf32> to vector<32x64xf32>
    %62 = arith.subf %11, %61 : vector<32x64xf32>
    %cst_26 = arith.constant 9.99999974E-6 : f32
    %63 = vector.broadcast %cst_26 : f32 to vector<1x64xf32>
    %64 = arith.addf %60, %63 : vector<1x64xf32>
    %65 = math.rsqrt %64 : vector<1x64xf32>
    %66 = vector.broadcast %65 : vector<1x64xf32> to vector<32x64xf32>
    %67 = arith.mulf %62, %66 : vector<32x64xf32>
    %68 = vector.broadcast %12 : vector<1x64xf32> to vector<32x64xf32>
    %69 = arith.mulf %67, %68 : vector<32x64xf32>
    %70 = vector.broadcast %13 : vector<1x64xf32> to vector<32x64xf32>
    %71 = arith.addf %69, %70 : vector<32x64xf32>
    %cst_27 = arith.constant 0.000000e+00 : f32
    %72 = vector.broadcast %cst_27 : f32 to vector<32x64xf32>
    %73 = arith.maximumf %71, %72 : vector<32x64xf32>
    %cst_28 = arith.constant 0.000000e+00 : f32
    %74 = vector.broadcast %cst_28 : f32 to vector<1x64xf32>
    %c0_29 = arith.constant 0 : index
    %c0_30 = arith.constant 0 : index
    %75 = vector.load %arg8[%c0_29, %c0_30] : memref<34x64xf32, #tpu.memory_space<vmem>>, vector<1x64xf32>
    tpu.vector_store %arg8[%c0_29, %c0_30], %74 {strides = array<i32>} : memref<34x64xf32, #tpu.memory_space<vmem>>, vector<1x64xf32>,
    %cst_31 = arith.constant 0.000000e+00 : f32
    %76 = vector.broadcast %cst_31 : f32 to vector<1x64xf32>
    %c33 = arith.constant 33 : index
    %c0_32 = arith.constant 0 : index
    %77 = vector.load %arg8[%c33, %c0_32] : memref<34x64xf32, #tpu.memory_space<vmem>>, vector<1x64xf32>
    tpu.vector_store %arg8[%c33, %c0_32], %76 {strides = array<i32>} : memref<34x64xf32, #tpu.memory_space<vmem>>, vector<1x64xf32>,
    %c1_33 = arith.constant 1 : index
    %c0_34 = arith.constant 0 : index
    %78 = vector.load %arg8[%c1_33, %c0_34] : memref<34x64xf32, #tpu.memory_space<vmem>>, vector<32x64xf32>
    tpu.vector_store %arg8[%c1_33, %c0_34], %73 {strides = array<i32>} : memref<34x64xf32, #tpu.memory_space<vmem>>, vector<32x64xf32>,
    %79 = tpu.iota {dimensions = array<i32: 0>} : vector<32x64xi32>
    %c16_i32 = arith.constant 16 : i32
    %c0_i32_35 = arith.constant 0 : i32
    %80 = arith.cmpi eq, %c16_i32, %c0_i32_35 : i32
    %c1_i32_36 = arith.constant 1 : i32
    %81 = arith.select %80, %c1_i32_36, %c16_i32 : i32
    %82 = vector.broadcast %81 : i32 to vector<32x64xi32>
    %83 = arith.remsi %79, %82 : vector<32x64xi32>
    %c0_i32_37 = arith.constant 0 : i32
    %84 = vector.broadcast %c0_i32_37 : i32 to vector<32x64xi32>
    %85 = arith.cmpi ne, %83, %84 : vector<32x64xi32>
    %c0_i32_38 = arith.constant 0 : i32
    %86 = vector.broadcast %c0_i32_38 : i32 to vector<32x64xi32>
    %87 = arith.cmpi slt, %83, %86 : vector<32x64xi32>
    %c0_i32_39 = arith.constant 0 : i32
    %88 = arith.cmpi slt, %81, %c0_i32_39 : i32
    %89 = vector.broadcast %88 : i1 to vector<32x64xi1>
    %90 = vector.broadcast %89 : vector<32x64xi1> to vector<32x64xi1>
    %91 = arith.xori %87, %90 : vector<32x64xi1>
    %92 = arith.andi %91, %85 : vector<32x64xi1>
    %93 = vector.broadcast %81 : i32 to vector<32x64xi32>
    %94 = arith.addi %83, %93 : vector<32x64xi32>
    %95 = arith.select %92, %94, %83 : vector<32x64xi1>, vector<32x64xi32>
    %c0_40 = arith.constant 0 : index
    %c0_41 = arith.constant 0 : index
    %96 = vector.load %arg8[%c0_40, %c0_41] : memref<34x64xf32, #tpu.memory_space<vmem>>, vector<32x64xf32>
    %c0_i32_42 = arith.constant 0 : i32
    %97 = vector.broadcast %c0_i32_42 : i32 to vector<32x64xi32>
    %98 = arith.cmpi eq, %95, %97 : vector<32x64xi32>
    %cst_43 = arith.constant 0.000000e+00 : f32
    %99 = vector.broadcast %cst_43 : f32 to vector<32x64xf32>
    %100 = arith.select %98, %99, %96 : vector<32x64xi1>, vector<32x64xf32>
    %101 = arith.truncf %100 : vector<32x64xf32> to vector<32x64xbf16>
    %c0_44 = arith.constant 0 : index
    %c0_45 = arith.constant 0 : index
    %c0_46 = arith.constant 0 : index
    %102 = vector.load %arg3[%c0_44, %c0_45, %c0_46] : memref<3x64x64xbf16, #tpu.memory_space<vmem>>, vector<1x64x64xbf16>
    %103 = vector.shape_cast %102 : vector<1x64x64xbf16> to vector<64x64xbf16>
    %cst_47 = arith.constant dense<0.000000e+00> : vector<32x64xf32>
    %104 = tpu.matmul %101, %103, %cst_47 {dimension_numbers = #tpu.dot_dimension_numbers<[1], [0], [0], [1], [0, 0, 1, 1], [], []>} : vector<32x64xbf16>, vector<64x64xbf16>, vector<32x64xf32> -> vector<32x64xf32>
    %c1_48 = arith.constant 1 : index
    %c0_49 = arith.constant 0 : index
    %105 = vector.load %arg8[%c1_48, %c0_49] : memref<34x64xf32, #tpu.memory_space<vmem>>, vector<32x64xf32>
    %106 = arith.truncf %105 : vector<32x64xf32> to vector<32x64xbf16>
    %c1_50 = arith.constant 1 : index
    %c0_51 = arith.constant 0 : index
    %c0_52 = arith.constant 0 : index
    %107 = vector.load %arg3[%c1_50, %c0_51, %c0_52] : memref<3x64x64xbf16, #tpu.memory_space<vmem>>, vector<1x64x64xbf16>
    %108 = vector.shape_cast %107 : vector<1x64x64xbf16> to vector<64x64xbf16>
    %cst_53 = arith.constant dense<0.000000e+00> : vector<32x64xf32>
    %109 = tpu.matmul %106, %108, %cst_53 {dimension_numbers = #tpu.dot_dimension_numbers<[1], [0], [0], [1], [0, 0, 1, 1], [], []>} : vector<32x64xbf16>, vector<64x64xbf16>, vector<32x64xf32> -> vector<32x64xf32>
    %110 = arith.addf %104, %109 : vector<32x64xf32>
    %c2_54 = arith.constant 2 : index
    %c0_55 = arith.constant 0 : index
    %111 = vector.load %arg8[%c2_54, %c0_55] : memref<34x64xf32, #tpu.memory_space<vmem>>, vector<32x64xf32>
    %c15_i32 = arith.constant 15 : i32
    %112 = vector.broadcast %c15_i32 : i32 to vector<32x64xi32>
    %113 = arith.cmpi eq, %95, %112 : vector<32x64xi32>
    %cst_56 = arith.constant 0.000000e+00 : f32
    %114 = vector.broadcast %cst_56 : f32 to vector<32x64xf32>
    %115 = arith.select %113, %114, %111 : vector<32x64xi1>, vector<32x64xf32>
    %116 = arith.truncf %115 : vector<32x64xf32> to vector<32x64xbf16>
    %c2_57 = arith.constant 2 : index
    %c0_58 = arith.constant 0 : index
    %c0_59 = arith.constant 0 : index
    %117 = vector.load %arg3[%c2_57, %c0_58, %c0_59] : memref<3x64x64xbf16, #tpu.memory_space<vmem>>, vector<1x64x64xbf16>
    %118 = vector.shape_cast %117 : vector<1x64x64xbf16> to vector<64x64xbf16>
    %cst_60 = arith.constant dense<0.000000e+00> : vector<32x64xf32>
    %119 = tpu.matmul %116, %118, %cst_60 {dimension_numbers = #tpu.dot_dimension_numbers<[1], [0], [0], [1], [0, 0, 1, 1], [], []>} : vector<32x64xbf16>, vector<64x64xbf16>, vector<32x64xf32> -> vector<32x64xf32>
    %120 = arith.addf %110, %119 : vector<32x64xf32>
    %c3 = arith.constant 3 : index
    %c0_61 = arith.constant 0 : index
    %121 = vector.load %arg6[%c3, %c0_61] : memref<10x128xf32, #tpu.memory_space<vmem>>, vector<1x64xf32>
    %122 = vector.broadcast %121 : vector<1x64xf32> to vector<32x64xf32>
    %123 = arith.addf %120, %122 : vector<32x64xf32>
    %c4 = arith.constant 4 : index
    %c0_62 = arith.constant 0 : index
    %124 = vector.load %arg6[%c4, %c0_62] : memref<10x128xf32, #tpu.memory_space<vmem>>, vector<1x64xf32>
    %c5 = arith.constant 5 : index
    %c0_63 = arith.constant 0 : index
    %125 = vector.load %arg6[%c5, %c0_63] : memref<10x128xf32, #tpu.memory_space<vmem>>, vector<1x64xf32>
    %126 = tpu.iota {dimensions = array<i32: 0>} : vector<64x64xi32>
    %c4_i32_64 = arith.constant 4 : i32
    %c0_i32_65 = arith.constant 0 : i32
    %127 = arith.cmpi eq, %c4_i32_64, %c0_i32_65 : i32
    %c1_i32_66 = arith.constant 1 : i32
    %128 = arith.select %127, %c1_i32_66, %c4_i32_64 : i32
    %129 = vector.broadcast %128 : i32 to vector<64x64xi32>
    %130 = arith.remsi %126, %129 : vector<64x64xi32>
    %c0_i32_67 = arith.constant 0 : i32
    %131 = vector.broadcast %c0_i32_67 : i32 to vector<64x64xi32>
    %132 = arith.cmpi ne, %130, %131 : vector<64x64xi32>
    %c0_i32_68 = arith.constant 0 : i32
    %133 = vector.broadcast %c0_i32_68 : i32 to vector<64x64xi32>
    %134 = arith.cmpi slt, %130, %133 : vector<64x64xi32>
    %c0_i32_69 = arith.constant 0 : i32
    %135 = arith.cmpi slt, %128, %c0_i32_69 : i32
    %136 = vector.broadcast %135 : i1 to vector<64x64xi1>
    %137 = vector.broadcast %136 : vector<64x64xi1> to vector<64x64xi1>
    %138 = arith.xori %134, %137 : vector<64x64xi1>
    %139 = arith.andi %138, %132 : vector<64x64xi1>
    %140 = vector.broadcast %128 : i32 to vector<64x64xi32>
    %141 = arith.addi %130, %140 : vector<64x64xi32>
    %142 = arith.select %139, %141, %130 : vector<64x64xi1>, vector<64x64xi32>
    %143 = tpu.iota {dimensions = array<i32: 1>} : vector<64x64xi32>
    %c4_i32_70 = arith.constant 4 : i32
    %c0_i32_71 = arith.constant 0 : i32
    %144 = arith.cmpi eq, %c4_i32_70, %c0_i32_71 : i32
    %c1_i32_72 = arith.constant 1 : i32
    %145 = arith.select %144, %c1_i32_72, %c4_i32_70 : i32
    %146 = vector.broadcast %145 : i32 to vector<64x64xi32>
    %147 = arith.remsi %143, %146 : vector<64x64xi32>
    %c0_i32_73 = arith.constant 0 : i32
    %148 = vector.broadcast %c0_i32_73 : i32 to vector<64x64xi32>
    %149 = arith.cmpi ne, %147, %148 : vector<64x64xi32>
    %c0_i32_74 = arith.constant 0 : i32
    %150 = vector.broadcast %c0_i32_74 : i32 to vector<64x64xi32>
    %151 = arith.cmpi slt, %147, %150 : vector<64x64xi32>
    %c0_i32_75 = arith.constant 0 : i32
    %152 = arith.cmpi slt, %145, %c0_i32_75 : i32
    %153 = vector.broadcast %152 : i1 to vector<64x64xi1>
    %154 = vector.broadcast %153 : vector<64x64xi1> to vector<64x64xi1>
    %155 = arith.xori %151, %154 : vector<64x64xi1>
    %156 = arith.andi %155, %149 : vector<64x64xi1>
    %157 = vector.broadcast %145 : i32 to vector<64x64xi32>
    %158 = arith.addi %147, %157 : vector<64x64xi32>
    %159 = arith.select %156, %158, %147 : vector<64x64xi1>, vector<64x64xi32>
    %160 = arith.cmpi eq, %142, %159 : vector<64x64xi32>
    %cst_76 = arith.constant 0.001953125 : f32
    %cst_77 = arith.constant 0.000000e+00 : f32
    %161 = vector.broadcast %cst_76 : f32 to vector<64x64xf32>
    %162 = vector.broadcast %cst_77 : f32 to vector<64x64xf32>
    %163 = arith.select %160, %161, %162 : vector<64x64xi1>, vector<64x64xf32>
    %cst_78 = arith.constant dense<0.000000e+00> : vector<64xf32>
    %164 = vector.multi_reduction <add>, %123, %cst_78 [0] : vector<32x64xf32> to vector<64xf32>
    %165 = vector.shape_cast %164 : vector<64xf32> to vector<1x64xf32>
    %166 = arith.mulf %123, %123 : vector<32x64xf32>
    %cst_79 = arith.constant dense<0.000000e+00> : vector<64xf32>
    %167 = vector.multi_reduction <add>, %166, %cst_79 [0] : vector<32x64xf32> to vector<64xf32>
    %168 = vector.shape_cast %167 : vector<64xf32> to vector<1x64xf32>
    %cst_80 = arith.constant dense<0.000000e+00> : vector<1x64xf32>
    %169 = tpu.matmul %165, %163, %cst_80 {dimension_numbers = #tpu.dot_dimension_numbers<[1], [0], [0], [1], [0, 0, 1, 1], [], []>} : vector<1x64xf32>, vector<64x64xf32>, vector<1x64xf32> -> vector<1x64xf32>
    %cst_81 = arith.constant dense<0.000000e+00> : vector<1x64xf32>
    %170 = tpu.matmul %168, %163, %cst_81 {dimension_numbers = #tpu.dot_dimension_numbers<[1], [0], [0], [1], [0, 0, 1, 1], [], []>} : vector<1x64xf32>, vector<64x64xf32>, vector<1x64xf32> -> vector<1x64xf32>
    %171 = arith.mulf %169, %169 : vector<1x64xf32>
    %172 = arith.subf %170, %171 : vector<1x64xf32>
    %173 = vector.broadcast %169 : vector<1x64xf32> to vector<32x64xf32>
    %174 = arith.subf %123, %173 : vector<32x64xf32>
    %cst_82 = arith.constant 9.99999974E-6 : f32
    %175 = vector.broadcast %cst_82 : f32 to vector<1x64xf32>
    %176 = arith.addf %172, %175 : vector<1x64xf32>
    %177 = math.rsqrt %176 : vector<1x64xf32>
    %178 = vector.broadcast %177 : vector<1x64xf32> to vector<32x64xf32>
    %179 = arith.mulf %174, %178 : vector<32x64xf32>
    %180 = vector.broadcast %124 : vector<1x64xf32> to vector<32x64xf32>
    %181 = arith.mulf %179, %180 : vector<32x64xf32>
    %182 = vector.broadcast %125 : vector<1x64xf32> to vector<32x64xf32>
    %183 = arith.addf %181, %182 : vector<32x64xf32>
    %cst_83 = arith.constant 0.000000e+00 : f32
    %184 = vector.broadcast %cst_83 : f32 to vector<32x64xf32>
    %185 = arith.maximumf %183, %184 : vector<32x64xf32>
    %186 = arith.truncf %185 : vector<32x64xf32> to vector<32x64xbf16>
    %c0_84 = arith.constant 0 : index
    %c0_85 = arith.constant 0 : index
    %187 = vector.load %arg4[%c0_84, %c0_85] : memref<64x128xbf16, #tpu.memory_space<vmem>>, vector<64x128xbf16>
    %cst_86 = arith.constant dense<0.000000e+00> : vector<32x128xf32>
    %188 = tpu.matmul %186, %187, %cst_86 {dimension_numbers = #tpu.dot_dimension_numbers<[1], [0], [0], [1], [0, 0, 1, 1], [], []>} : vector<32x64xbf16>, vector<64x128xbf16>, vector<32x128xf32> -> vector<32x128xf32>
    %c6 = arith.constant 6 : index
    %c0_87 = arith.constant 0 : index
    %189 = vector.load %arg6[%c6, %c0_87] : memref<10x128xf32, #tpu.memory_space<vmem>>, vector<1x128xf32>
    %190 = vector.broadcast %189 : vector<1x128xf32> to vector<32x128xf32>
    %191 = arith.addf %188, %190 : vector<32x128xf32>
    %c7 = arith.constant 7 : index
    %c0_88 = arith.constant 0 : index
    %192 = vector.load %arg6[%c7, %c0_88] : memref<10x128xf32, #tpu.memory_space<vmem>>, vector<1x128xf32>
    %c8 = arith.constant 8 : index
    %c0_89 = arith.constant 0 : index
    %193 = vector.load %arg6[%c8, %c0_89] : memref<10x128xf32, #tpu.memory_space<vmem>>, vector<1x128xf32>
    %194 = tpu.iota {dimensions = array<i32: 0>} : vector<128x128xi32>
    %c8_i32 = arith.constant 8 : i32
    %c0_i32_90 = arith.constant 0 : i32
    %195 = arith.cmpi eq, %c8_i32, %c0_i32_90 : i32
    %c1_i32_91 = arith.constant 1 : i32
    %196 = arith.select %195, %c1_i32_91, %c8_i32 : i32
    %197 = vector.broadcast %196 : i32 to vector<128x128xi32>
    %198 = arith.remsi %194, %197 : vector<128x128xi32>
    %c0_i32_92 = arith.constant 0 : i32
    %199 = vector.broadcast %c0_i32_92 : i32 to vector<128x128xi32>
    %200 = arith.cmpi ne, %198, %199 : vector<128x128xi32>
    %c0_i32_93 = arith.constant 0 : i32
    %201 = vector.broadcast %c0_i32_93 : i32 to vector<128x128xi32>
    %202 = arith.cmpi slt, %198, %201 : vector<128x128xi32>
    %c0_i32_94 = arith.constant 0 : i32
    %203 = arith.cmpi slt, %196, %c0_i32_94 : i32
    %204 = vector.broadcast %203 : i1 to vector<128x128xi1>
    %205 = vector.broadcast %204 : vector<128x128xi1> to vector<128x128xi1>
    %206 = arith.xori %202, %205 : vector<128x128xi1>
    %207 = arith.andi %206, %200 : vector<128x128xi1>
    %208 = vector.broadcast %196 : i32 to vector<128x128xi32>
    %209 = arith.addi %198, %208 : vector<128x128xi32>
    %210 = arith.select %207, %209, %198 : vector<128x128xi1>, vector<128x128xi32>
    %211 = tpu.iota {dimensions = array<i32: 1>} : vector<128x128xi32>
    %c8_i32_95 = arith.constant 8 : i32
    %c0_i32_96 = arith.constant 0 : i32
    %212 = arith.cmpi eq, %c8_i32_95, %c0_i32_96 : i32
    %c1_i32_97 = arith.constant 1 : i32
    %213 = arith.select %212, %c1_i32_97, %c8_i32_95 : i32
    %214 = vector.broadcast %213 : i32 to vector<128x128xi32>
    %215 = arith.remsi %211, %214 : vector<128x128xi32>
    %c0_i32_98 = arith.constant 0 : i32
    %216 = vector.broadcast %c0_i32_98 : i32 to vector<128x128xi32>
    %217 = arith.cmpi ne, %215, %216 : vector<128x128xi32>
    %c0_i32_99 = arith.constant 0 : i32
    %218 = vector.broadcast %c0_i32_99 : i32 to vector<128x128xi32>
    %219 = arith.cmpi slt, %215, %218 : vector<128x128xi32>
    %c0_i32_100 = arith.constant 0 : i32
    %220 = arith.cmpi slt, %213, %c0_i32_100 : i32
    %221 = vector.broadcast %220 : i1 to vector<128x128xi1>
    %222 = vector.broadcast %221 : vector<128x128xi1> to vector<128x128xi1>
    %223 = arith.xori %219, %222 : vector<128x128xi1>
    %224 = arith.andi %223, %217 : vector<128x128xi1>
    %225 = vector.broadcast %213 : i32 to vector<128x128xi32>
    %226 = arith.addi %215, %225 : vector<128x128xi32>
    %227 = arith.select %224, %226, %215 : vector<128x128xi1>, vector<128x128xi32>
    %228 = arith.cmpi eq, %210, %227 : vector<128x128xi32>
    %cst_101 = arith.constant 0.001953125 : f32
    %cst_102 = arith.constant 0.000000e+00 : f32
    %229 = vector.broadcast %cst_101 : f32 to vector<128x128xf32>
    %230 = vector.broadcast %cst_102 : f32 to vector<128x128xf32>
    %231 = arith.select %228, %229, %230 : vector<128x128xi1>, vector<128x128xf32>
    %cst_103 = arith.constant dense<0.000000e+00> : vector<128xf32>
    %232 = vector.multi_reduction <add>, %191, %cst_103 [0] : vector<32x128xf32> to vector<128xf32>
    %233 = vector.shape_cast %232 : vector<128xf32> to vector<1x128xf32>
    %234 = arith.mulf %191, %191 : vector<32x128xf32>
    %cst_104 = arith.constant dense<0.000000e+00> : vector<128xf32>
    %235 = vector.multi_reduction <add>, %234, %cst_104 [0] : vector<32x128xf32> to vector<128xf32>
    %236 = vector.shape_cast %235 : vector<128xf32> to vector<1x128xf32>
    %cst_105 = arith.constant dense<0.000000e+00> : vector<1x128xf32>
    %237 = tpu.matmul %233, %231, %cst_105 {dimension_numbers = #tpu.dot_dimension_numbers<[1], [0], [0], [1], [0, 0, 1, 1], [], []>} : vector<1x128xf32>, vector<128x128xf32>, vector<1x128xf32> -> vector<1x128xf32>
    %cst_106 = arith.constant dense<0.000000e+00> : vector<1x128xf32>
    %238 = tpu.matmul %236, %231, %cst_106 {dimension_numbers = #tpu.dot_dimension_numbers<[1], [0], [0], [1], [0, 0, 1, 1], [], []>} : vector<1x128xf32>, vector<128x128xf32>, vector<1x128xf32> -> vector<1x128xf32>
    %239 = arith.mulf %237, %237 : vector<1x128xf32>
    %240 = arith.subf %238, %239 : vector<1x128xf32>
    %241 = vector.broadcast %237 : vector<1x128xf32> to vector<32x128xf32>
    %242 = arith.subf %191, %241 : vector<32x128xf32>
    %cst_107 = arith.constant 9.99999974E-6 : f32
    %243 = vector.broadcast %cst_107 : f32 to vector<1x128xf32>
    %244 = arith.addf %240, %243 : vector<1x128xf32>
    %245 = math.rsqrt %244 : vector<1x128xf32>
    %246 = vector.broadcast %245 : vector<1x128xf32> to vector<32x128xf32>
    %247 = arith.mulf %242, %246 : vector<32x128xf32>
    %248 = vector.broadcast %192 : vector<1x128xf32> to vector<32x128xf32>
    %249 = arith.mulf %247, %248 : vector<32x128xf32>
    %250 = vector.broadcast %193 : vector<1x128xf32> to vector<32x128xf32>
    %251 = arith.addf %249, %250 : vector<32x128xf32>
    %252 = arith.addf %251, %6 : vector<32x128xf32>
    %cst_108 = arith.constant 0.000000e+00 : f32
    %253 = vector.broadcast %cst_108 : f32 to vector<32x128xf32>
    %254 = arith.maximumf %252, %253 : vector<32x128xf32>
    %c0_109 = arith.constant 0 : index
    %c0_110 = arith.constant 0 : index
    %255 = vector.load %arg7[%c0_109, %c0_110] : memref<32x128xf32, #tpu.memory_space<vmem>>, vector<32x128xf32>
    tpu.vector_store %arg7[%c0_109, %c0_110], %254 {strides = array<i32>} : memref<32x128xf32, #tpu.memory_space<vmem>>, vector<32x128xf32>,
    return
  }
  func.func @transform_0(%arg0: i32) -> (i32, i32) {
    %c0_i32 = arith.constant 0 : i32
    %c0_i32_0 = arith.constant 0 : i32
    %c0_i32_1 = arith.constant 0 : i32
    return %c0_i32, %c0_i32_0 : i32, i32
  }
  func.func @transform_1(%arg0: i32) -> (i32, i32) {
    %c0_i32 = arith.constant 0 : i32
    %c0_i32_0 = arith.constant 0 : i32
    %c0_i32_1 = arith.constant 0 : i32
    return %c0_i32, %c0_i32_0 : i32, i32
  }
  func.func @transform_2(%arg0: i32) -> (i32, i32, i32) {
    %c0_i32 = arith.constant 0 : i32
    %c0_i32_0 = arith.constant 0 : i32
    %c0_i32_1 = arith.constant 0 : i32
    %c0_i32_2 = arith.constant 0 : i32
    return %c0_i32, %c0_i32_0, %c0_i32_1 : i32, i32, i32
  }
  func.func @transform_3(%arg0: i32) -> (i32, i32) {
    %c0_i32 = arith.constant 0 : i32
    %c0_i32_0 = arith.constant 0 : i32
    %c0_i32_1 = arith.constant 0 : i32
    return %c0_i32, %c0_i32_0 : i32, i32
  }
  func.func @transform_4(%arg0: i32) -> (i32, i32) {
    %c0_i32 = arith.constant 0 : i32
    %c0_i32_0 = arith.constant 0 : i32
    %c0_i32_1 = arith.constant 0 : i32
    return %c0_i32, %c0_i32_0 : i32, i32
  }
  func.func @transform_5(%arg0: i32) -> (i32, i32) {
    %c0_i32 = arith.constant 0 : i32
    %c0_i32_0 = arith.constant 0 : i32
    %c0_i32_1 = arith.constant 0 : i32
    return %c0_i32, %c0_i32_0 : i32, i32
  }
  func.func @transform_6(%arg0: i32) -> (i32, i32) {
    %c0_i32 = arith.constant 0 : i32
    %c0_i32_0 = arith.constant 0 : i32
    %c0_i32_1 = arith.constant 0 : i32
    return %c0_i32, %c0_i32_0 : i32, i32
  }
}

</mosaic_0001>

<bundles_post_ra>
// kernel: tpu_custom_call.1
= control target key start
LH: loop header
LB: loop body
LE: loop exit
PB: predicated region body
PF: predicated region fallthrough
CT: control target
= control target key end

     0   :  { %11 = vsyncpa [#allocation4], 0  ;;  %s2145_s0 = inlined_call_operand.hbm [shape: f32[32,64], index: 0, kind: input, shape index: {}]   ;;  %s2146_s1 = inlined_call_operand.hbm [shape: bf16[64,64], index: 1, kind: input, shape index: {}]   ;;  %s2147_s2 = inlined_call_operand.hbm [shape: bf16[3,64,64], index: 2, kind: input, shape index: {}]   ;;  %s2148_s3 = inlined_call_operand.hbm [shape: bf16[64,128], index: 3, kind: input, shape index: {}]   ;;  %s2149_s4 = inlined_call_operand.hbm [shape: bf16[64,128], index: 4, kind: input, shape index: {}]   ;;  %s2150_s5 = inlined_call_operand.hbm [shape: f32[10,128], index: 5, kind: input, shape index: {}]   ;;  %s2151_s6 = inlined_call_operand.hbm [shape: f32[32,128], index: 6, kind: output, shape index: {}]  }
   0x1   :  { %12 = vsyncpa [#allocation7], 0 }
   0x2   :  { %13 = vsyncpa [#allocation10], 0 }
   0x3   :  { %14 = vsyncpa [#allocation13], 0  ;;  %s33_s23 = sshll.u32 %s2146_s1, 4  ;;  %s34_s23 = int_to_ptr.hbm [resolvable:$true] %s33_s23 }
   0x4   :  { %15 = vsyncpa [#allocation5], 0  ;;  %s1718_s24 = smov [#allocation6]   ;;  %s59_s28 = sshll.u32 %s2148_s3, 4  ;;  %s60_s28 = int_to_ptr.hbm [resolvable:$true] %s59_s28 }
   0x5   :  { %s35_s25 = sshll.u32 %s1718_s24, 4  ;;  %s1719_s29 = smov 64   ;;  %s36_s25 = int_to_ptr.vmem [resolvable:$true] %s35_s25 }
   0x6   :  { %s1720_s30 = smov 4   ;;  %s1721_s7 = smov [#allocation9]  }
   0x7   :  { %41 = dma.hbm_to_vmem [thread:$0]  %s34_s23, 512, %s36_s25, [#allocation7], %s1719_s29, %s1719_s29, %s1720_s30  }
   0x8   :  { %s61_s8 = sshll.u32 %s1721_s7, 4  ;;  %s20_s10 = sshll.u32 %s2145_s0, 4  ;;  %s62_s8 = int_to_ptr.vmem [resolvable:$true] %s61_s8  ;;  %s21_s10 = int_to_ptr.hbm [resolvable:$true] %s20_s10 }
   0x9   :  { %67 = dma.hbm_to_vmem [thread:$0]  %s60_s28, 512, %s62_s8, [#allocation10], %s1719_s29, %s1719_s29, %s1720_s30  }
   0xa   :  { %s1722_s3 = smov [#allocation3]   ;;  %s46_s14 = sshll.u32 %s2147_s2, 4  ;;  %s47_s14 = int_to_ptr.hbm [resolvable:$true] %s46_s14 }
   0xb   :  { %s22_s11 = sshll.u32 %s1722_s3, 4  ;;  %s1723_s15 = smov 128   ;;  %s23_s11 = int_to_ptr.vmem [resolvable:$true] %s22_s11 }
   0xc   :  { %s1724_s16 = smov 8   ;;  %s1725_s0 = smov [#allocation8]  }
   0xd   :  { %28 = dma.hbm_to_vmem [thread:$0]  %s21_s10, 512, %s23_s11, [#allocation4], %s1723_s15, %s1723_s15, %s1724_s16  }
   0xe   :  { %s48_s17 = sshll.u32 %s1725_s0, 4  ;;  %s72_s20 = sshll.u32 %s2149_s4, 4  ;;  %s49_s17 = int_to_ptr.vmem [resolvable:$true] %s48_s17  ;;  %s73_s20 = int_to_ptr.hbm [resolvable:$true] %s72_s20 }
   0xf   :  { %54 = dma.hbm_to_vmem [thread:$0]  %s47_s14, 1536, %s49_s17, [#allocation7], %s1719_s29, %s1719_s29, %s1720_s30  }
  0x10   :  { %s85_s22 = sshll.u32 %s2150_s5, 4  ;;  %s1726_s23 = smov [#allocation11]   ;;  %s86_s22 = int_to_ptr.hbm [resolvable:$true] %s85_s22 }
  0x11   :  { %s74_s24 = sshll.u32 %s1726_s23, 4  ;;  %s1727_s25 = smov [#allocation12]   ;;  %s75_s24 = int_to_ptr.vmem [resolvable:$true] %s74_s24 }
  0x12   :  { %80 = dma.hbm_to_vmem [thread:$0]  %s73_s20, 512, %s75_s24, [#allocation10], %s1719_s29, %s1719_s29, %s1720_s30  }
  0x13   :  { %s87_s4 = sshll.u32 %s1727_s25, 4  ;;  %s88_s4 = int_to_ptr.vmem [resolvable:$true] %s87_s4 }
  0x14   :  { %93 = dma.hbm_to_vmem [thread:$0]  %s86_s22, 256, %s88_s4, [#allocation13], %s1723_s15, %s1723_s15, %s1724_s16  }
  0x15   :  { %1708 = dma.done.wait [#allocation4], 512  }
  0x16   :  { %1709 = vsyncadd [#allocation4], 4294966784 }
  0x17   :  { %1710 = dma.done.wait [#allocation7], 2048  }
  0x18   :  { %1711 = vsyncadd [#allocation7], 4294965248 }
  0x19   :  { %1712 = dma.done.wait [#allocation10], 1024  }
  0x1a   :  { %1713 = vsyncadd [#allocation10], 4294966272 }
  0x1b   :  { %1714 = dma.done.wait [#allocation13], 256  }
  0x1c   :  { %1715 = vsyncadd [#allocation13], 4294967040  ;;  %v1494_v0 = vld [vmem:[#allocation6 + $0x18] sm:$0xff]  ;;  %v1493_v1 = vld [vmem:[#allocation6 + $0x10] sm:$0xff]  ;;  %vm159_vm0 = vcmask 523264   ;;  %v240_v10 = vlaneseq  ;;  %v1728_v21 = vmov 0.001953125  }
  0x1d   :  { %223 = vmatpush.bf16.msra.mxu1 %v1494_v0  ;;  %v1492_v2 = vld [vmem:[#allocation6 + $0x8] sm:$0xff]  ;;  %v1491_v3 = vld [vmem:[#allocation6] sm:$0xff]  ;;  %v121_v7 = vld [vmem:[#allocation3 + $0x10] sm:$0xff]  ;;  %vm488_vm9 = vcmask 516096   ;;  %s1730_s5 = smov [#allocation14]   ;;  %s1295_s29 = sshll.u32 %s2151_s6, 4  ;;  %s1296_s29 = int_to_ptr.hbm [resolvable:$true] %s1295_s29 }
  0x1e   :  { %v119_v4 = vld [vmem:[#allocation3] sm:$0xff]  ;;  %v120_v5 = vld [vmem:[#allocation3 + $0x8] sm:$0xff]  ;;  %v122_v8 = vld [vmem:[#allocation3 + $0x18] sm:$0xff]  ;;  %v1810_v11 = vshrl.u32 %v240_v10, 7  ;;  %v1815_v13 = vand.u32 127, %v240_v10  ;;  %s1293_s26 = sshll.u32 %s1730_s5, 4  ;;  %s1294_s26 = int_to_ptr.vmem [resolvable:$true] %s1293_s26 }
  0x1f   :  { %v1802_v6 = vpack.c.bf16 %v120_v5, %v119_v4  ;;  %v1806_v9 = vpack.c.bf16 %v122_v8, %v121_v7  ;;  %v1524_v40 = vld [vmem:[#allocation12] ss:$0 sm:$0xff]  ;;  %v1490_v18 = vld [vmem:[#allocation11 + $0x18] sm:$0xff]  ;;  %v1489_v19 = vld [vmem:[#allocation11 + $0x10] sm:$0xff] }
  0x20   :  { %v1813_v12 = vadd.s32 56, %v1810_v11  ;;  %v1818_v14 = vadd.s32 48, %v1810_v11  ;;  %v351_v16 = vand.u32 3, %v1815_v13  ;;  %v1832_v20 = vadd.s32 40, %v1810_v11  ;;  %170 = vmatpush.bf16.msra.mxu0 %v1490_v18  ;;  %v1488_v24 = vld [vmem:[#allocation11 + $0x8] sm:$0xff]  ;;  %v1502_v28 = vld [vmem:[#allocation8 + $0x38] sm:$0xff] }
  0x21   :  { %224 = vmatpush.bf16.msra.mxu1 %v1493_v1  ;;  %v1842_v23 = vadd.s32 32, %v1810_v11  ;;  %v1856_v26 = vadd.s32 24, %v1810_v11  ;;  %v1870_v30 = vadd.s32 16, %v1810_v11  ;;  %v1884_v33 = vadd.s32 8, %v1810_v11  ;;  %v1498_v31 = vld [vmem:[#allocation8 + $0x18] sm:$0xff]  ;;  %614 = vmatpush.bf16.msra.mxu2 %v1502_v28  ;;  %v1505_v37 = vld [vmem:[#allocation8 + $0x50] sm:$0xff] }
  0x22   :  { %v302_v15 = vand.u32 3, %v1813_v12  ;;  %v295_v17 = vand.u32 3, %v1818_v14  ;;  %v288_v22 = vand.u32 3, %v1832_v20  ;;  %v253_v34 = vand.u32 3, %v1810_v11  ;;  %v1497_v38 = vld [vmem:[#allocation8 + $0x10] sm:$0xff] }
  0x23   :  { %v281_v25 = vand.u32 3, %v1842_v23  ;;  %v274_v29 = vand.u32 3, %v1856_v26  ;;  %v267_v32 = vand.u32 3, %v1870_v30  ;;  %v260_v36 = vand.u32 3, %v1884_v33 }
  0x24   :  { %vm1823_vm1 = vcmp.eq.s32.totalorder %v302_v15, %v351_v16  ;;  %vm1827_vm2 = vcmp.eq.s32.totalorder %v295_v17, %v351_v16  ;;  %vm1850_vm3 = vcmp.eq.s32.totalorder %v288_v22, %v351_v16  ;;  %vm1908_vm8 = vcmp.eq.s32.totalorder %v253_v34, %v351_v16  ;;  %171 = vmatpush.bf16.msra.mxu0 %v1489_v19 }
  0x25   :  { %225 = vmatpush.bf16.msra.mxu1 %v1492_v2  ;;  %1356 = vmatpush.msk.msra.mxu3 %vm1823_vm1, %v1728_v21  ;;  %vm1864_vm4 = vcmp.eq.s32.totalorder %v281_v25, %v351_v16  ;;  %vm1878_vm5 = vcmp.eq.s32.totalorder %v274_v29, %v351_v16  ;;  %vm1893_vm6 = vcmp.eq.s32.totalorder %v267_v32, %v351_v16  ;;  %v1487_v25 = vld [vmem:[#allocation11] sm:$0xff]  ;;  %v1506_v29 = vld [vmem:[#allocation8 + $0x58] sm:$0xff]  ;;  %v506_v18 = vand.u32 15, %v1884_v33 }
  0x26   :  { %vm1904_vm7 = vcmp.eq.s32.totalorder %v260_v36, %v351_v16  ;;  %v1501_v36 = vld [vmem:[#allocation8 + $0x30] sm:$0xff] }
  0x27   :  { %1357 = vmatpush.msk.msra.mxu3 %vm1827_vm2, %v1728_v21  ;;  %615 = vmatpush.bf16.msra.mxu2 %v1501_v36  ;;  %vm683_vm14 = vcmp.eq.s32.totalorder %v506_v18, 15 }
  0x28   :  { %172 = vmatpush.bf16.msra.mxu0 %v1488_v24 }
  0x29   :  { %226 = vmatpush.bf16.msra.mxu1 %v1491_v3  ;;  %1358 = vmatpush.msk.msra.mxu3 %vm1850_vm3, %v1728_v21 }
  0x2b   :  { %1359 = vmatpush.msk.msra.mxu3 %vm1864_vm4, %v1728_v21 }
  0x2c   :  { %1345 = vmatmul.msk.bf16.vlgmr.msra.gmra.mxu1 %vm159_vm0, %v1802_v6  ;;  %173 = vmatpush.bf16.msra.mxu0 %v1487_v25 }
  0x2d   :  { %1347 = vmatpush.msk.msrb.mxu1 %vm1823_vm1, %v1728_v21  ;;  %1360 = vmatpush.msk.msra.mxu3 %vm1878_vm5, %v1728_v21 }
  0x2f   :  { %1348 = vmatpush.msk.msrb.mxu1 %vm1827_vm2, %v1728_v21  ;;  %1361 = vmatpush.msk.msra.mxu3 %vm1893_vm6, %v1728_v21 }
  0x30   :  { %1327 = vmatmul.msk.bf16.vlgmr.msra.gmra.mxu0 %vm159_vm0, %v1802_v6  ;;  %v1500_v6 = vld [vmem:[#allocation8 + $0x28] sm:$0xff] }
  0x31   :  { %1349 = vmatpush.msk.msrb.mxu1 %vm1850_vm3, %v1728_v21  ;;  %1362 = vmatpush.msk.msra.mxu3 %vm1904_vm7, %v1728_v21 }
  0x32   :  { %735 = vmatpush.bf16.msrb.mxu0 %v1506_v29  ;;  %616 = vmatpush.bf16.msra.mxu2 %v1500_v6 }
  0x33   :  { %1350 = vmatpush.msk.msrb.mxu1 %vm1864_vm4, %v1728_v21  ;;  %1363 = vmatpush.msk.msra.mxu3 %vm1908_vm8, %v1728_v21 }
  0x35   :  { %1351 = vmatpush.msk.msrb.mxu1 %vm1878_vm5, %v1728_v21  ;;  %663 = vmatpush.bf16.msrb.mxu3 %v1498_v31 }
  0x36   :  { %736 = vmatpush.bf16.msrb.mxu0 %v1505_v37  ;;  %v513_v37 = vand.u32 15, %v1870_v30 }
  0x37   :  { %1352 = vmatpush.msk.msrb.mxu1 %vm1893_vm6, %v1728_v21 }
  0x38   :  { %vm549_vm15 = vcmp.eq.s32.totalorder %v513_v37, 0 }
  0x39   :  { %1353 = vmatpush.msk.msrb.mxu1 %vm1904_vm7, %v1728_v21  ;;  %664 = vmatpush.bf16.msrb.mxu3 %v1497_v38  ;;  %v520_v38 = vand.u32 15, %v1856_v26 }
  0x3b   :  { %1354 = vmatpush.msk.msrb.mxu1 %vm1908_vm8, %v1728_v21 }
  0x3c   :  { %1346 = vmatmul.msk.bf16.gmra.mxu1 %vm159_vm0, %v1806_v9 }
  0x3d   :  { %1419 = vmatpush.msk.msra.mxu1 %vm1823_vm1, %v1728_v21 }
  0x3f   :  { %1420 = vmatpush.msk.msra.mxu1 %vm1827_vm2, %v1728_v21 }
  0x40   :  { %1328 = vmatmul.msk.bf16.gmra.mxu0 %vm159_vm0, %v1806_v9  ;;  %v1499_v9 = vld [vmem:[#allocation8 + $0x20] sm:$0xff] }
  0x41   :  { %1421 = vmatpush.msk.msra.mxu1 %vm1850_vm3, %v1728_v21  ;;  %617 = vmatpush.bf16.msra.mxu2 %v1499_v9 }
  0x43   :  { %1422 = vmatpush.msk.msra.mxu1 %vm1864_vm4, %v1728_v21 }
  0x45   :  { %1423 = vmatpush.msk.msra.mxu1 %vm1878_vm5, %v1728_v21 }
  0x47   :  { %1424 = vmatpush.msk.msra.mxu1 %vm1893_vm6, %v1728_v21 }
  0x49   :  { %1425 = vmatpush.msk.msra.mxu1 %vm1904_vm7, %v1728_v21 }
  0x4b   :  { %1426 = vmatpush.msk.msra.mxu1 %vm1908_vm8, %v1728_v21 }
  0xa9   :  { %v228_v27 = vpop.f32.mrf.mxu1 }
  0xaa   :  { %v1938_v43 = vadd.f32 %v1524_v40, %v228_v27 }
  0xac   :  { %v388_v46 = vmul.f32 %v1938_v43, %v1938_v43  ;;  %v375_v49 = vsel %vm159_vm0, %v1938_v43, 0.0 }
  0xae   :  { %v392_v54 = vsel %vm159_vm0, %v388_v46, 0.0  ;;  %v1495_v46 = vld [vmem:[#allocation8] sm:$0xff] }
  0xb1   :  { %v230_v39 = vpop.f32.mrf.mxu1 }
  0xb2   :  { %v1933_v41 = vadd.f32 %v1524_v40, %v230_v39 }
  0xb4   :  { %v389_v45 = vmul.f32 %v1933_v41, %v1933_v41  ;;  %v376_v47 = vsel %vm159_vm0, %v1933_v41, 0.0 }
  0xb5   :  { %v377_v52 = vadd.f32 %v376_v47, %v375_v49  ;;  %v1503_v47 = vld [vmem:[#allocation8 + $0x40] sm:$0xff] }
  0xb6   :  { %v393_v50 = vsel %vm159_vm0, %v389_v45, 0.0  ;;  %v1729_v45 = vmov 0.0  }
  0xb7   :  { %v394_v57 = vadd.f32 %v393_v50, %v392_v54  ;;  %489 = vst.msk [vmem:[#allocation2] sm:$0x1] %vm488_vm9, %v1729_v45 }
  0xb8   :  { %490 = vst.msk [vmem:[#allocation2 + $0x21] sm:$0x1] %vm488_vm9, %v1729_v45 }
  0xb9   :  { %v233_v42 = vpop.f32.mrf.mxu1 }
  0xba   :  { %v1940_v44 = vadd.f32 %v1524_v40, %v233_v42  ;;  %v1496_v42 = vld [vmem:[#allocation8 + $0x8] sm:$0xff] }
  0xbb   :  { %665 = vmatpush.bf16.msrb.mxu3 %v1496_v42 }
  0xbc   :  { %v390_v48 = vmul.f32 %v1940_v44, %v1940_v44  ;;  %v378_v51 = vsel %vm159_vm0, %v1940_v44, 0.0 }
  0xbd   :  { %v379_v58 = vadd.f32 %v378_v51, %v377_v52 }
  0xbe   :  { %v395_v55 = vsel %vm159_vm0, %v390_v48, 0.0 }
  0xbf   :  { %v396_v61 = vadd.f32 %v395_v55, %v394_v57  ;;  %666 = vmatpush.bf16.msrb.mxu3 %v1495_v46 }
  0xc1   :  { %v235_v53 = vpop.f32.mrf.mxu1 }
  0xc2   :  { %v1969_v56 = vadd.f32 %v1524_v40, %v235_v53  ;;  %v1504_v40 = vld [vmem:[#allocation8 + $0x48] sm:$0xff] }
  0xc3   :  { %737 = vmatpush.bf16.msrb.mxu0 %v1504_v40 }
  0xc4   :  { %v380_v59 = vsel %vm159_vm0, %v1969_v56, 0.0  ;;  %v391_v60 = vmul.f32 %v1969_v56, %v1969_v56 }
  0xc5   :  { %v381_v62 = vadd.f32 %v380_v59, %v379_v58 }
  0xc6   :  { %v397_v63 = vsel %vm159_vm0, %v391_v60, 0.0 }
  0xc7   :  { %v382_v0 = vrot.slane %v381_v62, 4  ;;  %v398_v1 = vadd.f32 %v397_v63, %v396_v61  ;;  %738 = vmatpush.bf16.msrb.mxu0 %v1503_v47 }
  0xc9   :  { %v383_v2 = vadd.f32 %v382_v0, %v381_v62  ;;  %v399_v3 = vrot.slane %v398_v1, 4  ;;  %v1525_v62 = vld [vmem:[#allocation12 + $0x1] ss:$0 sm:$0xff] }
  0xcb   :  { %v384_v4 = vrot.slane %v383_v2, 2  ;;  %v400_v5 = vadd.f32 %v399_v3, %v398_v1  ;;  %v1526_v3 = vld [vmem:[#allocation12 + $0x2] ss:$0 sm:$0xff] }
  0xcd   :  { %v385_v7 = vadd.f32 %v384_v4, %v383_v2  ;;  %v401_v8 = vrot.slane %v400_v5, 2 }
  0xcf   :  { %v386_v10 = vrot.slane %v385_v7, 1  ;;  %v402_v15 = vadd.f32 %v401_v8, %v400_v5 }
  0xd1   :  { %v387_v16 = vadd.f32 %v386_v10, %v385_v7  ;;  %v403_v17 = vrot.slane %v402_v15, 1 }
  0xd3   :  { %1355 = vmatmul.msk.f32.vlgmr.msrb.gmra.mxu1 %vm159_vm0, %v387_v16  ;;  %v404_v22 = vadd.f32 %v403_v17, %v402_v15 }
  0xd4   :  { %1428 = vmatpush.msk.msrb.mxu1 %vm1823_vm1, %v1728_v21  ;;  %vm685_vm1 = vcmp.eq.s32.totalorder %v520_v38, 15 }
  0xd5   :  { %1364 = vmatmul.msk.f32.vlgmr.msra.gmra.mxu3 %vm159_vm0, %v404_v22 }
  0xd6   :  { %1429 = vmatpush.msk.msrb.mxu1 %vm1827_vm2, %v1728_v21 }
  0xd8   :  { %1430 = vmatpush.msk.msrb.mxu1 %vm1850_vm3, %v1728_v21 }
  0xda   :  { %1431 = vmatpush.msk.msrb.mxu1 %vm1864_vm4, %v1728_v21 }
  0xdc   :  { %1432 = vmatpush.msk.msrb.mxu1 %vm1878_vm5, %v1728_v21 }
  0xde   :  { %1433 = vmatpush.msk.msrb.mxu1 %vm1893_vm6, %v1728_v21 }
  0xe0   :  { %1434 = vmatpush.msk.msrb.mxu1 %vm1904_vm7, %v1728_v21 }
  0xe2   :  { %1435 = vmatpush.msk.msrb.mxu1 %vm1908_vm8, %v1728_v21 }
 0x150   :  { %v425_v27 = vpop.f32.mrf.mxu1 }
 0x151   :  { %v451_v32 = vmul.f32 %v425_v27, %v425_v27  ;;  %v453_v52 = vperm.slane %v425_v27, 0 }
 0x153   :  { %v454_v55 = vsub.f32 %v1938_v43, %v453_v52  ;;  %v455_v58 = vsub.f32 %v1933_v41, %v453_v52  ;;  %v456_v59 = vsub.f32 %v1940_v44, %v453_v52  ;;  %v457_v60 = vsub.f32 %v1969_v56, %v453_v52 }
 0x154   :  { %v499_v56 = vand.u32 15, %v1810_v11 }
 0x156   :  { %vm547_vm13 = vcmp.eq.s32.totalorder %v499_v56, 0 }
 0x158   :  { %v448_v34 = vpop.f32.mrf.mxu3 }
 0x159   :  { %v452_v35 = vsub.f32 %v448_v34, %v451_v32 }
 0x15b   :  { %v458_v39 = vadd.f32 1e-05, %v452_v35 }
 0x15d   :  { %1534 = vrsqrt.f32 %v458_v39  ;;  %vm465_vm11 = vweird.f32 %v458_v39 }
 0x163   :  { %v1535_v48 = vpop.eup %1534 }
 0x164   :  { %v460_v49 = vmul.f32 %v1535_v48, %v458_v39  ;;  %vm466_vm10 = vweird.f32 %v1535_v48 }
 0x165   :  { %vm467_vm12 = vmor %vm465_vm11, %vm466_vm10 }
 0x166   :  { %v461_v50 = vmul.f32 %v1535_v48, %v460_v49 }
 0x168   :  { %v462_v51 = vmul.f32 0.5, %v461_v50 }
 0x16a   :  { %v463_v53 = vsub.f32 1.5, %v462_v51  ;;  %v2024_v51 = vpop.f32.mrf.mxu0 }
 0x16c   :  { %v464_v54 = vmul.f32 %v1535_v48, %v463_v53 }
 0x16e   :  { %v468_v57 = vsel %vm467_vm12, %v1535_v48, %v464_v54 }
 0x16f   :  { %v469_v61 = vperm.slane %v468_v57, 0 }
 0x171   :  { %v470_v63 = vmul.f32 %v469_v61, %v454_v55  ;;  %v471_v0 = vmul.f32 %v469_v61, %v455_v58  ;;  %v472_v1 = vmul.f32 %v469_v61, %v456_v59  ;;  %v473_v2 = vmul.f32 %v469_v61, %v457_v60 }
 0x172   :  { %v2026_v52 = vpop.f32.mrf.mxu0 }
 0x173   :  { %v475_v4 = vmul.f32 %v1525_v62, %v470_v63  ;;  %v476_v5 = vmul.f32 %v1525_v62, %v471_v0  ;;  %v477_v7 = vmul.f32 %v1525_v62, %v472_v1  ;;  %v478_v8 = vmul.f32 %v1525_v62, %v473_v2 }
 0x175   :  { %v480_v10 = vadd.f32 %v1526_v3, %v475_v4  ;;  %v481_v43 = vadd.f32 %v1526_v3, %v476_v5  ;;  %v482_v15 = vadd.f32 %v1526_v3, %v477_v7  ;;  %v483_v16 = vadd.f32 %v1526_v3, %v478_v8  ;;  %v1528_v5 = vld [vmem:[#allocation12 + $0x3] ss:$0 sm:$0xff] }
 0x177   :  { %v484_v41 = vmax.f32 %v480_v10, 0.0  ;;  %v485_v17 = vmax.f32 %v481_v43, 0.0  ;;  %v486_v44 = vmax.f32 %v482_v15, 0.0  ;;  %v487_v22 = vmax.f32 %v483_v16, 0.0 }
 0x179   :  { %491 = vst.msk [vmem:[#allocation2 + $0x1] sm:$0xff] %vm159_vm0, %v484_v41 }
 0x17a   :  { %492 = vst.msk [vmem:[#allocation2 + $0x9] sm:$0xff] %vm159_vm0, %v485_v17  ;;  %v2028_v53 = vpop.f32.mrf.mxu0 }
 0x17b   :  { %493 = vst.msk [vmem:[#allocation2 + $0x11] sm:$0xff] %vm159_vm0, %v486_v44 }
 0x17c   :  { %494 = vst.msk [vmem:[#allocation2 + $0x19] sm:$0xff] %vm159_vm0, %v487_v22 }
 0x180   :  { %v565_v19 = vld [vmem:[#allocation2 + $0x1] sm:$0xff] }
 0x181   :  { %v543_v24 = vld [vmem:[#allocation2] sm:$0xff]  ;;  %v566_v25 = vld [vmem:[#allocation2 + $0x9] sm:$0xff] }
 0x182   :  { %v544_v27 = vld [vmem:[#allocation2 + $0x8] sm:$0xff]  ;;  %v551_v28 = vsel %vm547_vm13, 0.0, %v543_v24  ;;  %v569_v31 = vpack.c.bf16 %v566_v25, %v565_v19  ;;  %v545_v39 = vld [vmem:[#allocation2 + $0x10] sm:$0xff]  ;;  %v2030_v54 = vpop.f32.mrf.mxu0 }
 0x183   :  { %v678_v29 = vld [vmem:[#allocation2 + $0x2] sm:$0xff]  ;;  %v555_v32 = vpack.c.bf16 %v544_v27, %v551_v28  ;;  %v679_v34 = vld [vmem:[#allocation2 + $0xa] sm:$0xff]  ;;  %v681_v6 = vld [vmem:[#allocation2 + $0x1a] sm:$0xff]  ;;  %v553_v9 = vsel %vm549_vm15, 0.0, %v545_v39 }
 0x184   :  { %v687_v35 = vsel %vm683_vm14, 0.0, %v679_v34  ;;  %1381 = vmatmul.msk.bf16.vlgmr.msra.gmra.mxu2 %vm159_vm0, %v569_v31  ;;  %v567_v40 = vld [vmem:[#allocation2 + $0x11] sm:$0xff]  ;;  %v568_v42 = vld [vmem:[#allocation2 + $0x19] sm:$0xff]  ;;  %v689_v47 = vsel %vm685_vm1, 0.0, %v681_v6 }
 0x185   :  { %1399 = vmatmul.msk.bf16.vlgmr.msrb.gmra.mxu3 %vm159_vm0, %v555_v32  ;;  %v690_v36 = vpack.c.bf16 %v687_v35, %v678_v29  ;;  %v546_v45 = vld [vmem:[#allocation2 + $0x18] sm:$0xff]  ;;  %v570_v48 = vpack.c.bf16 %v568_v42, %v567_v40 }
 0x186   :  { %v680_v46 = vld [vmem:[#allocation2 + $0x12] sm:$0xff]  ;;  %v556_v49 = vpack.c.bf16 %v546_v45, %v553_v9 }
 0x187   :  { %1417 = vmatmul.msk.bf16.vlgmr.msrb.gmra.mxu0 %vm159_vm0, %v690_v36  ;;  %v691_v50 = vpack.c.bf16 %v689_v47, %v680_v46 }
 0x194   :  { %1382 = vmatmul.msk.bf16.gmra.mxu2 %vm159_vm0, %v570_v48 }
 0x195   :  { %1400 = vmatmul.msk.bf16.gmra.mxu3 %vm159_vm0, %v556_v49 }
 0x197   :  { %1418 = vmatmul.msk.bf16.gmra.mxu0 %vm159_vm0, %v691_v50 }
 0x204   :  { %v740_v55 = vpop.f32.mrf.mxu0 }
 0x207   :  { %v619_v57 = vpop.f32.mrf.mxu2 }
 0x208   :  { %v668_v58 = vpop.f32.mrf.mxu3 }
 0x209   :  { %v669_v63 = vadd.f32 %v668_v58, %v619_v57 }
 0x20b   :  { %v750_v4 = vadd.f32 %v740_v55, %v669_v63  ;;  %v1509_v63 = vld [vmem:[#allocation9 + $0x10] sm:$0xff] }
 0x20c   :  { %v742_v59 = vpop.f32.mrf.mxu0 }
 0x20d   :  { %v2034_v43 = vadd.f32 %v1528_v5, %v750_v4 }
 0x20f   :  { %v621_v60 = vpop.f32.mrf.mxu2  ;;  %v775_v44 = vmul.f32 %v2034_v43, %v2034_v43  ;;  %v762_v24 = vsel %vm159_vm0, %v2034_v43, 0.0 }
 0x210   :  { %v670_v61 = vpop.f32.mrf.mxu3 }
 0x211   :  { %v671_v62 = vadd.f32 %v670_v61, %v621_v60  ;;  %v779_v31 = vsel %vm159_vm0, %v775_v44, 0.0  ;;  %v1510_v61 = vld [vmem:[#allocation9 + $0x18] sm:$0xff] }
 0x212   :  { %921 = vmatpush.bf16.msrb.mxu2 %v1510_v61  ;;  %v941_v61 = vadd.s32 88, %v1810_v11 }
 0x213   :  { %v751_v0 = vadd.f32 %v742_v59, %v671_v62 }
 0x214   :  { %v745_v1 = vpop.f32.mrf.mxu0 }
 0x215   :  { %v2032_v8 = vadd.f32 %v1528_v5, %v751_v0  ;;  %v1508_v0 = vld [vmem:[#allocation9 + $0x8] sm:$0xff] }
 0x216   :  { %922 = vmatpush.bf16.msrb.mxu2 %v1509_v63  ;;  %v940_v63 = vadd.s32 80, %v1810_v11 }
 0x217   :  { %v624_v2 = vpop.f32.mrf.mxu2  ;;  %v776_v16 = vmul.f32 %v2032_v8, %v2032_v8  ;;  %v763_v22 = vsel %vm159_vm0, %v2032_v8, 0.0 }
 0x218   :  { %v673_v3 = vpop.f32.mrf.mxu3  ;;  %v764_v29 = vadd.f32 %v763_v22, %v762_v24 }
 0x219   :  { %v674_v7 = vadd.f32 %v673_v3, %v624_v2  ;;  %v780_v25 = vsel %vm159_vm0, %v776_v16, 0.0  ;;  %v1507_v3 = vld [vmem:[#allocation9] sm:$0xff] }
 0x21a   :  { %v781_v35 = vadd.f32 %v780_v25, %v779_v31  ;;  %923 = vmatpush.bf16.msrb.mxu2 %v1508_v0  ;;  %v1529_v25 = vld [vmem:[#allocation12 + $0x4] ss:$0 sm:$0xff]  ;;  %v1020_v0 = vand.u32 7, %v940_v63 }
 0x21b   :  { %v752_v10 = vadd.f32 %v745_v1, %v674_v7 }
 0x21c   :  { %v747_v19 = vpop.f32.mrf.mxu0 }
 0x21d   :  { %v2036_v15 = vadd.f32 %v1528_v5, %v752_v10 }
 0x21e   :  { %924 = vmatpush.bf16.msrb.mxu2 %v1507_v3 }
 0x21f   :  { %v626_v41 = vpop.f32.mrf.mxu2  ;;  %v777_v56 = vmul.f32 %v2036_v15, %v2036_v15  ;;  %v765_v27 = vsel %vm159_vm0, %v2036_v15, 0.0 }
 0x220   :  { %v675_v17 = vpop.f32.mrf.mxu3  ;;  %v766_v36 = vadd.f32 %v765_v27, %v764_v29  ;;  %v1530_v29 = vld [vmem:[#allocation12 + $0x5] ss:$0 sm:$0xff] }
 0x221   :  { %v676_v18 = vadd.f32 %v675_v17, %v626_v41  ;;  %v782_v32 = vsel %vm159_vm0, %v777_v56, 0.0 }
 0x222   :  { %v783_v39 = vadd.f32 %v782_v32, %v781_v35 }
 0x223   :  { %v753_v28 = vadd.f32 %v747_v19, %v676_v18 }
 0x225   :  { %v2053_v34 = vadd.f32 %v1528_v5, %v753_v28 }
 0x227   :  { %v767_v37 = vsel %vm159_vm0, %v2053_v34, 0.0  ;;  %v778_v38 = vmul.f32 %v2053_v34, %v2053_v34 }
 0x228   :  { %v768_v6 = vadd.f32 %v767_v37, %v766_v36 }
 0x229   :  { %v784_v40 = vsel %vm159_vm0, %v778_v38, 0.0 }
 0x22a   :  { %v769_v42 = vrot.slane %v768_v6, 4  ;;  %v785_v45 = vadd.f32 %v784_v40, %v783_v39 }
 0x22c   :  { %v770_v9 = vadd.f32 %v769_v42, %v768_v6  ;;  %v786_v46 = vrot.slane %v785_v45, 4 }
 0x22e   :  { %v771_v47 = vrot.slane %v770_v9, 2  ;;  %v787_v48 = vadd.f32 %v786_v46, %v785_v45 }
 0x230   :  { %v772_v49 = vadd.f32 %v771_v47, %v770_v9  ;;  %v788_v50 = vrot.slane %v787_v48, 2 }
 0x232   :  { %v773_v55 = vrot.slane %v772_v49, 1  ;;  %v789_v58 = vadd.f32 %v788_v50, %v787_v48 }
 0x234   :  { %v774_v57 = vadd.f32 %v773_v55, %v772_v49  ;;  %v790_v59 = vrot.slane %v789_v58, 1  ;;  %v944_v55 = vadd.s32 112, %v1810_v11 }
 0x236   :  { %1427 = vmatmul.msk.f32.vlgmr.msra.gmra.mxu1 %vm159_vm0, %v774_v57  ;;  %v791_v60 = vadd.f32 %v790_v59, %v789_v58  ;;  %v1048_v57 = vand.u32 7, %v944_v55  ;;  %v943_v58 = vadd.s32 104, %v1810_v11  ;;  %v942_v59 = vadd.s32 96, %v1810_v11 }
 0x23e   :  { %1436 = vmatmul.msk.f32.vlgmr.msrb.gmra.mxu1 %vm159_vm0, %v791_v60  ;;  %v1034_v60 = vand.u32 7, %v942_v59 }
 0x2b3   :  { %v812_v62 = vpop.f32.mrf.mxu1 }
 0x2b4   :  { %v838_v1 = vmul.f32 %v812_v62, %v812_v62  ;;  %v840_v44 = vperm.slane %v812_v62, 0  ;;  %v1027_v62 = vand.u32 7, %v941_v61 }
 0x2b6   :  { %v841_v18 = vsub.f32 %v2034_v43, %v840_v44  ;;  %v842_v19 = vsub.f32 %v2032_v8, %v840_v44  ;;  %v843_v37 = vsub.f32 %v2036_v15, %v840_v44  ;;  %v844_v38 = vsub.f32 %v2053_v34, %v840_v44 }
 0x2b7   :  { %v2069_v15 = vand.u32 7, %v1815_v13  ;;  %v945_v34 = vadd.s32 120, %v1810_v11  ;;  %v1041_v13 = vand.u32 7, %v943_v58 }
 0x2b9   :  { %v1055_v50 = vand.u32 7, %v945_v34  ;;  %vm1163_vm6 = vcmp.eq.s32.totalorder %v1041_v13, %v2069_v15  ;;  %vm1162_vm7 = vcmp.eq.s32.totalorder %v1034_v60, %v2069_v15  ;;  %vm1161_vm8 = vcmp.eq.s32.totalorder %v1027_v62, %v2069_v15 }
 0x2ba   :  { %vm1160_vm9 = vcmp.eq.s32.totalorder %v1020_v0, %v2069_v15 }
 0x2bb   :  { %v835_v2 = vpop.f32.mrf.mxu1  ;;  %vm1165_vm5 = vcmp.eq.s32.totalorder %v1055_v50, %v2069_v15 }
 0x2bc   :  { %v839_v4 = vsub.f32 %v835_v2, %v838_v1  ;;  %1455 = vmatpush.msk.msra.mxu3 %vm1165_vm5, %v1728_v21  ;;  %1471 = vmatpush.msk.msra.mxu0 %vm1165_vm5, %v1728_v21  ;;  %v939_v1 = vadd.s32 72, %v1810_v11  ;;  %v938_v2 = vadd.s32 64, %v1810_v11 }
 0x2be   :  { %v845_v5 = vadd.f32 1e-05, %v839_v4  ;;  %v1013_v3 = vand.u32 7, %v939_v1  ;;  %v1006_v4 = vand.u32 7, %v938_v2  ;;  %v1532_v2 = vld [vmem:[#allocation12 + $0x7] ss:$0 sm:$0xff] }
 0x2c0   :  { %1536 = vrsqrt.f32 %v845_v5  ;;  %vm852_vm3 = vweird.f32 %v845_v5  ;;  %vm1159_vm10 = vcmp.eq.s32.totalorder %v1013_v3, %v2069_v15  ;;  %vm1158_vm11 = vcmp.eq.s32.totalorder %v1006_v4, %v2069_v15  ;;  %v1527_v3 = vld [vmem:[#allocation12 + $0x9] ss:$0 sm:$0xff] }
 0x2c6   :  { %v1537_v7 = vpop.eup %1536 }
 0x2c7   :  { %v847_v10 = vmul.f32 %v1537_v7, %v845_v5  ;;  %vm853_vm2 = vweird.f32 %v1537_v7  ;;  %v999_v5 = vand.u32 7, %v1813_v12  ;;  %v978_v12 = vand.u32 7, %v1842_v23 }
 0x2c8   :  { %vm854_vm4 = vmor %vm852_vm3, %vm853_vm2  ;;  %v950_v23 = vand.u32 7, %v1810_v11  ;;  %v1531_v11 = vld [vmem:[#allocation12 + $0x6] ss:$0 sm:$0xff] }
 0x2c9   :  { %v848_v16 = vmul.f32 %v1537_v7, %v847_v10  ;;  %vm1157_vm12 = vcmp.eq.s32.totalorder %v999_v5, %v2069_v15  ;;  %v985_v10 = vand.u32 7, %v1832_v20  ;;  %vm1154_vm15 = vcmp.eq.s32.totalorder %v978_v12, %v2069_v15 }
 0x2ca   :  { %v957_v20 = vand.u32 7, %v1884_v33 }
 0x2cb   :  { %v849_v41 = vmul.f32 0.5, %v848_v16  ;;  %vm1155_vm14 = vcmp.eq.s32.totalorder %v985_v10, %v2069_v15 }
 0x2cc   :  { %vm1151_vm3 = vcmp.eq.s32.totalorder %v957_v20, %v2069_v15 }
 0x2cd   :  { %v850_v17 = vsub.f32 1.5, %v849_v41  ;;  %v964_v41 = vand.u32 7, %v1870_v30 }
 0x2cf   :  { %v851_v22 = vmul.f32 %v1537_v7, %v850_v17  ;;  %vm1152_vm2 = vcmp.eq.s32.totalorder %v964_v41, %v2069_v15 }
 0x2d1   :  { %v855_v56 = vsel %vm854_vm4, %v1537_v7, %v851_v22  ;;  %v992_v7 = vand.u32 7, %v1818_v14  ;;  %v971_v14 = vand.u32 7, %v1856_v26  ;;  %vm1150_vm4 = vcmp.eq.s32.totalorder %v950_v23, %v2069_v15 }
 0x2d2   :  { %v856_v24 = vperm.slane %v855_v56, 0  ;;  %v176_v23 = vadd.f32 %v1527_v3, %v2024_v51 }
 0x2d3   :  { %vm1156_vm13 = vcmp.eq.s32.totalorder %v992_v7, %v2069_v15  ;;  %vm1153_vm1 = vcmp.eq.s32.totalorder %v971_v14, %v2069_v15 }
 0x2d4   :  { %v857_v27 = vmul.f32 %v856_v24, %v841_v18  ;;  %v858_v28 = vmul.f32 %v856_v24, %v842_v19  ;;  %v859_v42 = vmul.f32 %v856_v24, %v843_v37  ;;  %v860_v43 = vmul.f32 %v856_v24, %v844_v38 }
 0x2d6   :  { %v862_v31 = vmul.f32 %v1529_v25, %v857_v27  ;;  %v863_v32 = vmul.f32 %v1529_v25, %v858_v28  ;;  %v864_v8 = vmul.f32 %v1529_v25, %v859_v42  ;;  %v865_v45 = vmul.f32 %v1529_v25, %v860_v43 }
 0x2d8   :  { %v867_v35 = vadd.f32 %v1530_v29, %v862_v31  ;;  %v868_v36 = vadd.f32 %v1530_v29, %v863_v32  ;;  %v869_v9 = vadd.f32 %v1530_v29, %v864_v8  ;;  %v870_v46 = vadd.f32 %v1530_v29, %v865_v45 }
 0x2da   :  { %v871_v39 = vmax.f32 %v867_v35, 0.0  ;;  %v872_v6 = vmax.f32 %v868_v36, 0.0  ;;  %v873_v47 = vmax.f32 %v869_v9, 0.0  ;;  %v874_v48 = vmax.f32 %v870_v46, 0.0 }
 0x2dc   :  { %v875_v40 = vpack.c.bf16 %v872_v6, %v871_v39  ;;  %v876_v49 = vpack.c.bf16 %v874_v48, %v873_v47 }
 0x2de   :  { %1453 = vmatmul.msk.bf16.vlgmr.msrb.gmra.mxu2 %vm159_vm0, %v875_v40 }
 0x2ee   :  { %1454 = vmatmul.msk.bf16.gmra.mxu2 %vm159_vm0, %v876_v49  ;;  %vm1164_vm0 = vcmp.eq.s32.totalorder %v1048_v57, %v2069_v15 }
 0x2ef   :  { %1456 = vmatpush.msk.msra.mxu3 %vm1164_vm0, %v1728_v21  ;;  %1472 = vmatpush.msk.msra.mxu0 %vm1164_vm0, %v1728_v21 }
 0x2f1   :  { %1457 = vmatpush.msk.msra.mxu3 %vm1163_vm6, %v1728_v21  ;;  %1473 = vmatpush.msk.msra.mxu0 %vm1163_vm6, %v1728_v21 }
 0x2f3   :  { %1458 = vmatpush.msk.msra.mxu3 %vm1162_vm7, %v1728_v21  ;;  %1474 = vmatpush.msk.msra.mxu0 %vm1162_vm7, %v1728_v21 }
 0x2f5   :  { %1459 = vmatpush.msk.msra.mxu3 %vm1161_vm8, %v1728_v21  ;;  %1475 = vmatpush.msk.msra.mxu0 %vm1161_vm8, %v1728_v21 }
 0x2f7   :  { %1460 = vmatpush.msk.msra.mxu3 %vm1160_vm9, %v1728_v21  ;;  %1476 = vmatpush.msk.msra.mxu0 %vm1160_vm9, %v1728_v21 }
 0x2f9   :  { %1461 = vmatpush.msk.msra.mxu3 %vm1159_vm10, %v1728_v21  ;;  %1477 = vmatpush.msk.msra.mxu0 %vm1159_vm10, %v1728_v21 }
 0x2fb   :  { %1462 = vmatpush.msk.msra.mxu3 %vm1158_vm11, %v1728_v21  ;;  %1478 = vmatpush.msk.msra.mxu0 %vm1158_vm11, %v1728_v21 }
 0x2fd   :  { %1463 = vmatpush.msk.msra.mxu3 %vm1157_vm12, %v1728_v21  ;;  %1479 = vmatpush.msk.msra.mxu0 %vm1157_vm12, %v1728_v21 }
 0x2ff   :  { %1464 = vmatpush.msk.msra.mxu3 %vm1156_vm13, %v1728_v21  ;;  %1480 = vmatpush.msk.msra.mxu0 %vm1156_vm13, %v1728_v21 }
 0x301   :  { %1465 = vmatpush.msk.msra.mxu3 %vm1155_vm14, %v1728_v21  ;;  %1481 = vmatpush.msk.msra.mxu0 %vm1155_vm14, %v1728_v21 }
 0x303   :  { %1466 = vmatpush.msk.msra.mxu3 %vm1154_vm15, %v1728_v21  ;;  %1482 = vmatpush.msk.msra.mxu0 %vm1154_vm15, %v1728_v21 }
 0x305   :  { %1467 = vmatpush.msk.msra.mxu3 %vm1153_vm1, %v1728_v21  ;;  %1483 = vmatpush.msk.msra.mxu0 %vm1153_vm1, %v1728_v21 }
 0x307   :  { %1468 = vmatpush.msk.msra.mxu3 %vm1152_vm2, %v1728_v21  ;;  %1484 = vmatpush.msk.msra.mxu0 %vm1152_vm2, %v1728_v21 }
 0x309   :  { %1469 = vmatpush.msk.msra.mxu3 %vm1151_vm3, %v1728_v21  ;;  %1485 = vmatpush.msk.msra.mxu0 %vm1151_vm3, %v1728_v21 }
 0x30b   :  { %1470 = vmatpush.msk.msra.mxu3 %vm1150_vm4, %v1728_v21  ;;  %1486 = vmatpush.msk.msra.mxu0 %vm1150_vm4, %v1728_v21 }
 0x361   :  { %v926_v16 = vpop.f32.mrf.mxu2 }
 0x362   :  { %v927_v17 = vadd.f32 %v1531_v11, %v926_v16  ;;  %v1533_v16 = vld [vmem:[#allocation12 + $0x8] ss:$0 sm:$0xff] }
 0x364   :  { %v1191_v56 = vmul.f32 %v927_v17, %v927_v17 }
 0x369   :  { %v928_v26 = vpop.f32.mrf.mxu2 }
 0x36a   :  { %v929_v33 = vadd.f32 %v1531_v11, %v928_v26  ;;  %v178_v26 = vadd.f32 %v1527_v3, %v2026_v52 }
 0x36c   :  { %v1192_v22 = vmul.f32 %v929_v33, %v929_v33  ;;  %v1182_v18 = vadd.f32 %v929_v33, %v927_v17 }
 0x36e   :  { %v1195_v25 = vadd.f32 %v1192_v22, %v1191_v56 }
 0x371   :  { %v931_v30 = vpop.f32.mrf.mxu2 }
 0x372   :  { %v932_v44 = vadd.f32 %v1531_v11, %v931_v30  ;;  %v183_v30 = vadd.f32 %v1527_v3, %v2030_v54 }
 0x374   :  { %v1193_v19 = vmul.f32 %v932_v44, %v932_v44  ;;  %v1183_v27 = vadd.f32 %v1182_v18, %v932_v44 }
 0x376   :  { %v1196_v29 = vadd.f32 %v1195_v25, %v1193_v19 }
 0x379   :  { %v933_v24 = vpop.f32.mrf.mxu2 }
 0x37a   :  { %v934_v28 = vadd.f32 %v1531_v11, %v933_v24  ;;  %v181_v11 = vadd.f32 %v1527_v3, %v2028_v53 }
 0x37c   :  { %v1184_v31 = vadd.f32 %v1183_v27, %v934_v28  ;;  %v1194_v32 = vmul.f32 %v934_v28, %v934_v28 }
 0x37e   :  { %v1185_v35 = vrot.slane %v1184_v31, 4  ;;  %v1197_v36 = vadd.f32 %v1196_v29, %v1194_v32 }
 0x380   :  { %v1186_v37 = vadd.f32 %v1185_v35, %v1184_v31  ;;  %v1198_v21 = vrot.slane %v1197_v36, 4 }
 0x382   :  { %v1187_v38 = vrot.slane %v1186_v37, 2  ;;  %v1199_v39 = vadd.f32 %v1198_v21, %v1197_v36 }
 0x384   :  { %v1188_v6 = vadd.f32 %v1187_v38, %v1186_v37  ;;  %v1200_v40 = vrot.slane %v1199_v39, 2 }
 0x386   :  { %v1189_v42 = vrot.slane %v1188_v6, 1  ;;  %v1201_v43 = vadd.f32 %v1200_v40, %v1199_v39 }
 0x388   :  { %v1190_v8 = vadd.f32 %v1189_v42, %v1188_v6  ;;  %v1202_v45 = vrot.slane %v1201_v43, 1 }
 0x38a   :  { %1220 = vmatmul.f32.vlgmr.msra.gmra.mxu3 %v1190_v8  ;;  %v1203_v9 = vadd.f32 %v1202_v45, %v1201_v43 }
 0x38c   :  { %1240 = vmatmul.f32.vlgmr.msra.gmra.mxu0 %v1203_v9 }
 0x409   :  { %v1241_v48 = vpop.f32.mrf.mxu0 }
 0x40d   :  { %v1221_v46 = vpop.f32.mrf.mxu3 }
 0x40e   :  { %v1244_v47 = vmul.f32 %v1221_v46, %v1221_v46  ;;  %v1246_v58 = vperm.slane %v1221_v46, 0 }
 0x410   :  { %v1245_v49 = vsub.f32 %v1241_v48, %v1244_v47  ;;  %v1247_v60 = vsub.f32 %v927_v17, %v1246_v58  ;;  %v1248_v62 = vsub.f32 %v929_v33, %v1246_v58  ;;  %v1249_v63 = vsub.f32 %v932_v44, %v1246_v58 }
 0x411   :  { %v1250_v0 = vsub.f32 %v934_v28, %v1246_v58 }
 0x412   :  { %v1251_v15 = vadd.f32 1e-05, %v1245_v49 }
 0x414   :  { %1538 = vrsqrt.f32 %v1251_v15  ;;  %vm1258_vm0 = vweird.f32 %v1251_v15 }
 0x41a   :  { %v1539_v34 = vpop.eup %1538 }
 0x41b   :  { %v1253_v50 = vmul.f32 %v1539_v34, %v1251_v15  ;;  %vm1259_vm5 = vweird.f32 %v1539_v34 }
 0x41c   :  { %vm1260_vm6 = vmor %vm1258_vm0, %vm1259_vm5 }
 0x41d   :  { %v1254_v55 = vmul.f32 %v1539_v34, %v1253_v50 }
 0x41f   :  { %v1255_v57 = vmul.f32 0.5, %v1254_v55 }
 0x421   :  { %v1256_v59 = vsub.f32 1.5, %v1255_v57 }
 0x423   :  { %v1257_v13 = vmul.f32 %v1539_v34, %v1256_v59 }
 0x425   :  { %v1261_v61 = vsel %vm1260_vm6, %v1539_v34, %v1257_v13 }
 0x426   :  { %v1262_v1 = vperm.slane %v1261_v61, 0 }
 0x428   :  { %v1263_v4 = vmul.f32 %v1262_v1, %v1247_v60  ;;  %v1264_v5 = vmul.f32 %v1262_v1, %v1248_v62  ;;  %v1265_v7 = vmul.f32 %v1262_v1, %v1249_v63  ;;  %v1266_v10 = vmul.f32 %v1262_v1, %v1250_v0 }
 0x42a   :  { %v1268_v12 = vmul.f32 %v1532_v2, %v1263_v4  ;;  %v1269_v14 = vmul.f32 %v1532_v2, %v1264_v5  ;;  %v1270_v41 = vmul.f32 %v1532_v2, %v1265_v7  ;;  %v1271_v20 = vmul.f32 %v1532_v2, %v1266_v10 }
 0x42c   :  { %v1273_v33 = vadd.f32 %v1533_v16, %v1268_v12  ;;  %v1274_v17 = vadd.f32 %v1533_v16, %v1269_v14  ;;  %v1275_v44 = vadd.f32 %v1533_v16, %v1270_v41  ;;  %v1276_v22 = vadd.f32 %v1533_v16, %v1271_v20 }
 0x42e   :  { %v1277_v56 = vadd.f32 %v1273_v33, %v176_v23  ;;  %v1278_v18 = vadd.f32 %v1274_v17, %v178_v26  ;;  %v1279_v19 = vadd.f32 %v1275_v44, %v181_v11  ;;  %v1280_v24 = vadd.f32 %v1276_v22, %v183_v30 }
 0x430   :  { %v1281_v25 = vmax.f32 %v1277_v56, 0.0  ;;  %v1282_v27 = vmax.f32 %v1278_v18, 0.0  ;;  %v1283_v28 = vmax.f32 %v1279_v19, 0.0  ;;  %v1284_v51 = vmax.f32 %v1280_v24, 0.0 }
 0x432   :  { %1285 = vst [vmem:[#allocation14] sm:$0xff] %v1281_v25 }
 0x433   :  { %1286 = vst [vmem:[#allocation14 + $0x8] sm:$0xff] %v1282_v27 }
 0x434   :  { %1287 = vst [vmem:[#allocation14 + $0x10] sm:$0xff] %v1283_v28 }
 0x435   :  { %1288 = vst [vmem:[#allocation14 + $0x18] sm:$0xff] %v1284_v51 }
 0x436   :  { %1301 = dma.vmem_to_hbm [thread:$0]  %s1294_s26, 512, %s1296_s29, [#allocation5], %s1723_s15, %s1723_s15, %s1724_s16  }
 0x437   :  { %1716 = dma.done.wait [#allocation5], 512  }
 0x438   :  { %1717 = vsyncadd [#allocation5], 4294966784 }
 0x439   :  { %1306 = vsyncpa [#allocation4], 1 }
 0x43a   :  { %1307 = vsyncpa [#allocation7], 1 }
 0x43b   :  { %1308 = vsyncpa [#allocation10], 1 }
 0x43c   :  { %1309 = vsyncpa [#allocation13], 1 }
 0x43d   :  { %1310 = vsyncpa [#allocation5], 1 }

</bundles_post_ra>
